<compile_context>
chip_gen: v7x
topology: tpu7x:2x2x1
jax: 0.10.0
libtpu: 0.0.40
codegen_flags: <defaults>
</compile_context>

<pallas_src>
import functools

import jax
import jax.numpy as jnp
from jax.experimental import pallas as pl
from jax.experimental.pallas import tpu as pltpu


def _round_up(x, m):
    return (x + m - 1) // m * m


# ----------------------- tiled linear (GRU input projections) -----------------------

def _linear_kernel(x_ref, w_ref, b_ref, o_ref):
    x = x_ref[...].astype(jnp.bfloat16)
    w = w_ref[...].astype(jnp.bfloat16)
    y = jnp.dot(x, w, preferred_element_type=jnp.float32) + b_ref[...]
    o_ref[...] = y.astype(o_ref.dtype)


def pallas_linear(x, w, b, tile_m=256):
    """x:(M,K) @ w:(K,N) + b:(N,) -> (M,N); M-tiled so DMA overlaps MXU work."""
    M, K = x.shape
    N = w.shape[1]
    tm = min(tile_m, _round_up(M, 8))
    Mp = _round_up(M, tm)
    if Mp != M:
        x = jnp.pad(x, ((0, Mp - M), (0, 0)))
    out = pl.pallas_call(
        _linear_kernel,
        grid=(Mp // tm,),
        in_specs=[
            pl.BlockSpec((tm, K), lambda i: (i, 0)),
            pl.BlockSpec((K, N), lambda i: (0, 0)),   # weight stays resident across M tiles
            pl.BlockSpec((1, N), lambda i: (0, 0)),
        ],
        out_specs=pl.BlockSpec((tm, N), lambda i: (i, 0)),
        out_shape=jax.ShapeDtypeStruct((Mp, N), jnp.float32),
        compiler_params=pltpu.CompilerParams(dimension_semantics=("parallel",)),
    )(x, w, b.reshape(1, N))
    return out[:M] if Mp != M else out


# -------------------- bidirectional GRU recurrence (weight-resident) --------------------

def _bigru_step_kernel(xf_ref, xb_ref, mf_ref, mb_ref, off_ref, whh_ref, bhh_ref,
                       of_ref, ob_ref, hf_scr, hb_scr, *, H):
    t = pl.program_id(0)

    @pl.when(t == 0)
    def _():
        hf_scr[...] = jnp.zeros_like(hf_scr)
        hb_scr[...] = jnp.zeros_like(hb_scr)

    def step(x_ref, m_ref, h_scr, o_ref, d):
        sl = slice(3 * H * d, 3 * H * (d + 1))
        xg = x_ref[0][:, sl] + off_ref[...][:, sl]          # (B,3H) precomputed gates
        h = h_scr[...]                                      # (B,H)
        hg = jnp.dot(h, whh_ref[d], preferred_element_type=jnp.float32) + bhh_ref[d]
        xr, xz, xn = xg[:, :H], xg[:, H:2 * H], xg[:, 2 * H:]
        hr, hz, hn = hg[:, :H], hg[:, H:2 * H], hg[:, 2 * H:]
        r = jax.nn.sigmoid(xr + hr)
        z = jax.nn.sigmoid(xz + hz)
        n = jnp.tanh(xn + r * hn)
        h_new = (1.0 - z) * n + z * h
        m = m_ref[0]                                        # (B,1) time mask
        h_next = m * h_new + (1.0 - m) * h                  # freeze state past seq end
        h_scr[...] = h_next
        o_ref[0] = m * h_next                               # packed output: zeros past end

    step(xf_ref, mf_ref, hf_scr, of_ref, 0)                 # forward:  time t
    step(xb_ref, mb_ref, hb_scr, ob_ref, 1)                 # backward: time T-1-t


def gru_layer(x_tm, mask_tm, p, off):
    """One bidirectional GRU layer.

    x_tm: (T,B,Din) time-major input; mask_tm: (T,B,1); off: (B,6H) per-batch gate
    offset added every step (used to inject qry_mean into the doc layer-0 gates).
    Returns (T,B,2H).
    """
    T, B, Din = x_tm.shape
    H = p['whh'].shape[1]
    # Fused fwd+bwd input projection for the whole sequence (big pipelined matmul).
    xg = pallas_linear(x_tm.reshape(T * B, Din), p['wih'], p['bih']).reshape(T, B, 6 * H)

    of, ob = pl.pallas_call(
        functools.partial(_bigru_step_kernel, H=H),
        grid=(T,),
        in_specs=[
            pl.BlockSpec((1, B, 6 * H), lambda t: (t, 0, 0)),           # fwd gates at t
            pl.BlockSpec((1, B, 6 * H), lambda t: (T - 1 - t, 0, 0)),   # bwd gates at T-1-t
            pl.BlockSpec((1, B, 1), lambda t: (t, 0, 0)),
            pl.BlockSpec((1, B, 1), lambda t: (T - 1 - t, 0, 0)),
            pl.BlockSpec((B, 6 * H), lambda t: (0, 0)),                 # constant offset
            pl.BlockSpec((2, H, 3 * H), lambda t: (0, 0, 0)),           # w_hh resident
            pl.BlockSpec((2, 1, 3 * H), lambda t: (0, 0, 0)),           # b_hh resident
        ],
        out_specs=[pl.BlockSpec((1, B, H), lambda t: (t, 0, 0)),
                   pl.BlockSpec((1, B, H), lambda t: (T - 1 - t, 0, 0))],
        out_shape=(jax.ShapeDtypeStruct((T, B, H), jnp.float32),
                   jax.ShapeDtypeStruct((T, B, H), jnp.float32)),
        scratch_shapes=[pltpu.VMEM((B, H), jnp.float32),
                        pltpu.VMEM((B, H), jnp.float32)],
        compiler_params=pltpu.CompilerParams(dimension_semantics=("arbitrary",)),
    )(xg, xg, mask_tm, mask_tm, off, p['whh'], p['bhh'])

    return jnp.concatenate([of, ob], axis=-1)               # (T,B,2H) [fwd || bwd]


# ---------------- self-attention + fused masked temporal mean ----------------

def _attn_mean_kernel(x_ref, mrow_ref, mcol_ref, w_ref, b_ref, o_ref):
    x = x_ref[0]                                            # (T,D) encoder output
    km = mrow_ref[0]                                        # (1,T) key mask
    qm = mcol_ref[0]                                        # (T,1) query/time mask
    xb = x.astype(jnp.bfloat16)
    proj = (jnp.dot(xb, w_ref[...].astype(jnp.bfloat16),
                    preferred_element_type=jnp.float32) + b_ref[...])
    # scores = proj @ x^T as an NT dot_general (no in-kernel transpose copy)
    s = jax.lax.dot_general(proj.astype(jnp.bfloat16), xb,
                            (((1,), (1,)), ((), ())),
                            preferred_element_type=jnp.float32)      # (T,T)
    # TODO(synk): reference Attention assumed without 1/sqrt(d) score scaling.
    # TODO(synk): for very long T, tile KV with online softmax (flash-style) to
    # bound the T^2 scores in VMEM on v7x; fine at moderate T per batch element.
    s = jnp.where(km > 0.5, s, -1e30)
    s = s - jnp.max(s, axis=-1, keepdims=True)
    p = jnp.exp(s)
    p = p * pl.reciprocal(jnp.sum(p, axis=-1, keepdims=True), approx=True)
    attn_out = jnp.dot(p.astype(jnp.bfloat16), xb, preferred_element_type=jnp.float32)
    # Masked temporal mean of cat([attn_out, x], -1): padded rows excluded,
    # divided by the true sequence length (sum of the mask).
    inv_len = 1.0 / jnp.sum(qm, axis=0, keepdims=True)                # (1,1)
    mean_out = jnp.sum(attn_out * qm, axis=0, keepdims=True) * inv_len
    mean_enc = jnp.sum(x * qm, axis=0, keepdims=True) * inv_len
    o_ref[0] = jnp.concatenate([mean_out, mean_enc], axis=-1)         # (1,2D)


def pallas_attn_mean(x, mask, w, b):
    """x:(B,T,D) self-attention + masked mean over time of cat([out, x]) -> (B,2D)."""
    B, T, D = x.shape
    mrow = mask.astype(jnp.float32).reshape(B, 1, T)
    mcol = mask.astype(jnp.float32).reshape(B, T, 1)
    out = pl.pallas_call(
        _attn_mean_kernel,
        grid=(B,),
        in_specs=[
            pl.BlockSpec((1, T, D), lambda i: (i, 0, 0)),
            pl.BlockSpec((1, 1, T), lambda i: (i, 0, 0)),
            pl.BlockSpec((1, T, 1), lambda i: (i, 0, 0)),
            pl.BlockSpec((D, D), lambda i: (0, 0)),
            pl.BlockSpec((1, D), lambda i: (0, 0)),
        ],
        out_specs=pl.BlockSpec((1, 1, 2 * D), lambda i: (i, 0, 0)),
        out_shape=jax.ShapeDtypeStruct((B, 1, 2 * D), jnp.float32),
        compiler_params=pltpu.CompilerParams(dimension_semantics=("parallel",)),
    )(x, mrow, mcol, w, b.reshape(1, D))
    return out.reshape(B, 2 * D)


# ------------------------------ classification head ------------------------------

def _head_kernel(dm_ref, qm_ref, w1_ref, b1_ref, w2_ref, b2_ref, o_ref):
    dm = dm_ref[...]                                        # (B,4H) doc [attn||enc] mean
    qm = qm_ref[...]                                        # (B,4H) qry [attn||enc] mean
    w1 = w1_ref[...]
    C = dm.shape[1]
    h = (jnp.dot(dm.astype(jnp.bfloat16), w1[:C].astype(jnp.bfloat16),
                 preferred_element_type=jnp.float32)
         + jnp.dot(qm.astype(jnp.bfloat16), w1[C:].astype(jnp.bfloat16),
                   preferred_element_type=jnp.float32)
         + b1_ref[...])
    h = jnp.maximum(h, 0.0)
    o_ref[...] = (jnp.dot(h.astype(jnp.bfloat16), w2_ref[...].astype(jnp.bfloat16),
                          preferred_element_type=jnp.float32) + b2_ref[...])


def pallas_head(doc_mean, qry_mean, w1, b1, w2, b2):
    B, C = doc_mean.shape
    Hh = w1.shape[1]
    O = w2.shape[1]
    return pl.pallas_call(
        _head_kernel,
        grid=(1,),
        in_specs=[
            pl.BlockSpec((B, C), lambda i: (0, 0)),
            pl.BlockSpec((B, qry_mean.shape[1]), lambda i: (0, 0)),
            pl.BlockSpec((w1.shape[0], Hh), lambda i: (0, 0)),
            pl.BlockSpec((1, Hh), lambda i: (0, 0)),
            pl.BlockSpec((Hh, O), lambda i: (0, 0)),
            pl.BlockSpec((1, O), lambda i: (0, 0)),
        ],
        out_specs=pl.BlockSpec((B, O), lambda i: (0, 0)),
        out_shape=jax.ShapeDtypeStruct((B, O), jnp.float32),
    )(doc_mean, qry_mean, w1, b1.reshape(1, Hh), w2, b2.reshape(1, O))


# ---------------------------------- parameters ----------------------------------

def init_params(key, embed_dim, hidden_dim):
    H = hidden_dim
    keys = iter(jax.random.split(key, 64))

    def w(shape, scale=0.1):
        return scale * jax.random.normal(next(keys), shape, jnp.float32)

    def gru_layer_params(din):
        # wih = [W_ih_fwd^T || W_ih_bwd^T] -> (din, 6H); whh[d] = W_hh_dir^T -> (H, 3H)
        return {'wih': w((din, 6 * H)), 'bih': w((6 * H,)),
                'whh': w((2, H, 3 * H)), 'bhh': w((2, 1, 3 * H))}

    doc_l0 = gru_layer_params(embed_dim)
    # query-mean part of the doc layer-0 input weights (rows E:E+4H of the PyTorch W_ih)
    doc_l0['wih_q'] = w((4 * H, 6 * H))

    return {
        'qry_gru': [gru_layer_params(embed_dim), gru_layer_params(2 * H)],
        'doc_gru': [doc_l0, gru_layer_params(2 * H)],
        'qry_attn_w': w((2 * H, 2 * H)), 'qry_attn_b': w((2 * H,)),
        'doc_attn_w': w((2 * H, 2 * H)), 'doc_attn_b': w((2 * H,)),
        'dense1_w': w((8 * H, H)), 'dense1_b': w((H,)),     # input = [doc(4H) || qry(4H)]
        'out_w': w((H, 3)), 'out_b': w((3,)),
    }


# ------------------------------------ forward ------------------------------------

def classification_forward(params, doc_embed, doc_len, doc_mask,
                           qry_embed, qry_len, qry_mask):
    # doc_len / qry_len are implied by the masks; lengths inside kernels are
    # computed as sum(mask) on the fly (avoids sub-(8,128) scalar VMEM blocks).
    del doc_len, qry_len
    B = doc_embed.shape[0]
    H = params['dense1_w'].shape[1]
    zero_off = jnp.zeros((B, 6 * H), jnp.float32)

    # ---- query encoder (time-major internally) ----
    qry_x = jnp.transpose(qry_embed, (1, 0, 2))                        # (Tq,B,E)
    qry_m_tm = jnp.transpose(qry_mask, (1, 0))[:, :, None]             # (Tq,B,1)
    h = qry_x
    for p in params['qry_gru']:
        h = gru_layer(h, qry_m_tm, p, zero_off)
    qry_encode = jnp.transpose(h, (1, 0, 2))                           # (B,Tq,2H)

    # query self-attention + masked mean of cat([qry_output, qry_encode]) -> (B,4H)
    qry_mean = pallas_attn_mean(qry_encode, qry_mask,
                                params['qry_attn_w'], params['qry_attn_b'])

    # ---- document encoder; qry_mean injected as a constant gate offset in layer 0
    #      (replaces expand(B,Td,4H) + concat in HBM) ----
    doc_x = jnp.transpose(doc_embed, (1, 0, 2))                        # (Td,B,E)
    doc_m_tm = jnp.transpose(doc_mask, (1, 0))[:, :, None]             # (Td,B,1)
    off0 = jnp.dot(qry_mean, params['doc_gru'][0]['wih_q'])            # (B,6H), tiny
    h = doc_x
    for li, p in enumerate(params['doc_gru']):
        h = gru_layer(h, doc_m_tm, p, off0 if li == 0 else zero_off)
    doc_encode = jnp.transpose(h, (1, 0, 2))                           # (B,Td,2H)

    # doc self-attention + masked mean of cat([doc_output, doc_encode]) -> (B,4H)
    doc_mean = pallas_attn_mean(doc_encode, doc_mask,
                                params['doc_attn_w'], params['doc_attn_b'])

    # head: dense1(cat([doc_mean, qry_mean])) -> relu -> out_layer -> (B,3)
    # (the mean of the broadcast qry_expand over valid doc steps equals qry_mean)
    return pallas_head(doc_mean, qry_mean,
                       params['dense1_w'], params['dense1_b'],
                       params['out_w'], params['out_b'])


# -------------------------------------- main --------------------------------------

if __name__ == "__main__":
    key = jax.random.PRNGKey(0)
    B, Td, Tq = 2, 8, 6
    E, H = 16, 8

    k1, k2, k3 = jax.random.split(key, 3)
    doc_embed = jax.random.normal(k1, (B, Td, E), jnp.float32)
    qry_embed = jax.random.normal(k2, (B, Tq, E), jnp.float32)
    doc_len = jnp.array([8, 5], jnp.int32)
    qry_len = jnp.array([6, 4], jnp.int32)
    doc_mask = (jnp.arange(Td)[None, :] < doc_len[:, None]).astype(jnp.float32)
    qry_mask = (jnp.arange(Tq)[None, :] < qry_len[:, None]).astype(jnp.float32)

    params = init_params(k3, E, H)

    fwd = jax.jit(classification_forward)
    out = fwd(params, doc_embed, doc_len, doc_mask, qry_embed, qry_len, qry_mask)
    jax.block_until_ready(out)
    assert out.shape == (B, 3) and out.dtype == jnp.float32
    print("KERNEL_OK")
</pallas_src>

<mosaic_0001>
module attributes {stable_mosaic.version = 11 : i64} {
  func.func @_linear_kernel(%arg0: i32, %arg1: memref<16x16xf32, #tpu.memory_space<vmem>>, %arg2: memref<16x48xf32, #tpu.memory_space<vmem>>, %arg3: memref<1x48xf32, #tpu.memory_space<vmem>>, %arg4: memref<16x48xf32, #tpu.memory_space<vmem>>) attributes {dimension_semantics = [#tpu.dimension_semantics<parallel>], iteration_bounds = array<i64: 1>, scalar_prefetch = 0 : i64, scratch_operands = 0 : i64, tpu.core_type = #tpu.core_type<tc>, window_params = [{transform_indices = @transform_0, window_bounds = array<i64: 16, 16>}, {pipeline_mode = #tpu.pipeline_mode<synchronous>, transform_indices = @transform_1, window_bounds = array<i64: 16, 48>}, {pipeline_mode = #tpu.pipeline_mode<synchronous>, transform_indices = @transform_2, window_bounds = array<i64: 1, 48>}, {transform_indices = @transform_3, window_bounds = array<i64: 16, 48>}]} {
    %c0 = arith.constant 0 : index
    %c0_0 = arith.constant 0 : index
    %0 = vector.load %arg1[%c0, %c0_0] : memref<16x16xf32, #tpu.memory_space<vmem>>, vector<16x16xf32>
    %1 = arith.truncf %0 : vector<16x16xf32> to vector<16x16xbf16>
    %c0_1 = arith.constant 0 : index
    %c0_2 = arith.constant 0 : index
    %2 = vector.load %arg2[%c0_1, %c0_2] : memref<16x48xf32, #tpu.memory_space<vmem>>, vector<16x48xf32>
    %3 = arith.truncf %2 : vector<16x48xf32> to vector<16x48xbf16>
    %cst = arith.constant dense<0.000000e+00> : vector<16x48xf32>
    %4 = tpu.matmul %1, %3, %cst {dimension_numbers = #tpu.dot_dimension_numbers<[1], [0], [0], [1], [0, 0, 1, 1], [], []>} : vector<16x16xbf16>, vector<16x48xbf16>, vector<16x48xf32> -> vector<16x48xf32>
    %c0_3 = arith.constant 0 : index
    %c0_4 = arith.constant 0 : index
    %5 = vector.load %arg3[%c0_3, %c0_4] : memref<1x48xf32, #tpu.memory_space<vmem>>, vector<1x48xf32>
    %6 = vector.broadcast %5 : vector<1x48xf32> to vector<16x48xf32>
    %7 = arith.addf %4, %6 : vector<16x48xf32>
    %c0_5 = arith.constant 0 : index
    %c0_6 = arith.constant 0 : index
    %8 = vector.load %arg4[%c0_5, %c0_6] : memref<16x48xf32, #tpu.memory_space<vmem>>, vector<16x48xf32>
    tpu.vector_store %arg4[%c0_5, %c0_6], %7 {strides = array<i32>} : memref<16x48xf32, #tpu.memory_space<vmem>>, vector<16x48xf32>,
    return
  }
  func.func @transform_0(%arg0: i32) -> (i32, i32) {
    %c0_i32 = arith.constant 0 : i32
    %c0_i32_0 = arith.constant 0 : i32
    return %arg0, %c0_i32 : i32, i32
  }
  func.func @transform_1(%arg0: i32) -> (i32, i32) {
    %c0_i32 = arith.constant 0 : i32
    %c0_i32_0 = arith.constant 0 : i32
    %c0_i32_1 = arith.constant 0 : i32
    return %c0_i32, %c0_i32_0 : i32, i32
  }
  func.func @transform_2(%arg0: i32) -> (i32, i32) {
    %c0_i32 = arith.constant 0 : i32
    %c0_i32_0 = arith.constant 0 : i32
    %c0_i32_1 = arith.constant 0 : i32
    return %c0_i32, %c0_i32_0 : i32, i32
  }
  func.func @transform_3(%arg0: i32) -> (i32, i32) {
    %c0_i32 = arith.constant 0 : i32
    %c0_i32_0 = arith.constant 0 : i32
    return %arg0, %c0_i32 : i32, i32
  }
}

module attributes {stable_mosaic.version = 11 : i64} {
  func.func @_bigru_step_kernel(%arg0: i32, %arg1: memref<1x2x48xf32, #tpu.memory_space<vmem>>, %arg2: memref<1x2x48xf32, #tpu.memory_space<vmem>>, %arg3: memref<1x2x1xf32, #tpu.memory_space<vmem>>, %arg4: memref<1x2x1xf32, #tpu.memory_space<vmem>>, %arg5: memref<2x48xf32, #tpu.memory_space<vmem>>, %arg6: memref<2x8x24xf32, #tpu.memory_space<vmem>>, %arg7: memref<2x1x24xf32, #tpu.memory_space<vmem>>, %arg8: memref<1x2x8xf32, #tpu.memory_space<vmem>>, %arg9: memref<1x2x8xf32, #tpu.memory_space<vmem>>, %arg10: memref<2x8xf32, #tpu.memory_space<vmem>>, %arg11: memref<2x8xf32, #tpu.memory_space<vmem>>) attributes {dimension_semantics = [#tpu.dimension_semantics<arbitrary>], iteration_bounds = array<i64: 6>, scalar_prefetch = 0 : i64, scratch_operands = 2 : i64, tpu.core_type = #tpu.core_type<tc>, window_params = [{transform_indices = @transform_0, window_bounds = array<i64: 1, 2, 48>}, {transform_indices = @transform_1, window_bounds = array<i64: 1, 2, 48>}, {transform_indices = @transform_2, window_bounds = array<i64: 1, 2, 1>}, {transform_indices = @transform_3, window_bounds = array<i64: 1, 2, 1>}, {pipeline_mode = #tpu.pipeline_mode<synchronous>, transform_indices = @transform_4, window_bounds = array<i64: 2, 48>}, {pipeline_mode = #tpu.pipeline_mode<synchronous>, transform_indices = @transform_5, window_bounds = array<i64: 2, 8, 24>}, {pipeline_mode = #tpu.pipeline_mode<synchronous>, transform_indices = @transform_6, window_bounds = array<i64: 2, 1, 24>}, {transform_indices = @transform_7, window_bounds = array<i64: 1, 2, 8>}, {transform_indices = @transform_8, window_bounds = array<i64: 1, 2, 8>}]} {
    %c0_i32 = arith.constant 0 : i32
    %0 = arith.cmpi eq, %arg0, %c0_i32 : i32
    %1 = arith.extui %0 : i1 to i32
    %c0_i32_0 = arith.constant 0 : i32
    %2 = arith.cmpi ne, %1, %c0_i32_0 : i32
    scf.if %2 {
      %cst_50 = arith.constant 0.000000e+00 : f32
      %113 = vector.broadcast %cst_50 : f32 to vector<2x8xf32>
      %c0_51 = arith.constant 0 : index
      %c0_52 = arith.constant 0 : index
      %114 = vector.load %arg10[%c0_51, %c0_52] : memref<2x8xf32, #tpu.memory_space<vmem>>, vector<2x8xf32>
      tpu.vector_store %arg10[%c0_51, %c0_52], %113 {strides = array<i32>} : memref<2x8xf32, #tpu.memory_space<vmem>>, vector<2x8xf32>,
      %cst_53 = arith.constant 0.000000e+00 : f32
      %115 = vector.broadcast %cst_53 : f32 to vector<2x8xf32>
      %c0_54 = arith.constant 0 : index
      %c0_55 = arith.constant 0 : index
      %116 = vector.load %arg11[%c0_54, %c0_55] : memref<2x8xf32, #tpu.memory_space<vmem>>, vector<2x8xf32>
      tpu.vector_store %arg11[%c0_54, %c0_55], %115 {strides = array<i32>} : memref<2x8xf32, #tpu.memory_space<vmem>>, vector<2x8xf32>,
    } else {
    }
    %c0 = arith.constant 0 : index
    %c0_1 = arith.constant 0 : index
    %c0_2 = arith.constant 0 : index
    %3 = vector.load %arg1[%c0, %c0_1, %c0_2] : memref<1x2x48xf32, #tpu.memory_space<vmem>>, vector<1x2x48xf32>
    %4 = vector.shape_cast %3 : vector<1x2x48xf32> to vector<2x48xf32>
    %5 = vector.extract_strided_slice %4 {offsets = [0, 0], sizes = [2, 24], strides = [1, 1]} : vector<2x48xf32> to vector<2x24xf32>
    %c0_3 = arith.constant 0 : index
    %c0_4 = arith.constant 0 : index
    %6 = vector.load %arg5[%c0_3, %c0_4] : memref<2x48xf32, #tpu.memory_space<vmem>>, vector<2x48xf32>
    %7 = vector.extract_strided_slice %6 {offsets = [0, 0], sizes = [2, 24], strides = [1, 1]} : vector<2x48xf32> to vector<2x24xf32>
    %8 = arith.addf %5, %7 : vector<2x24xf32>
    %c0_5 = arith.constant 0 : index
    %c0_6 = arith.constant 0 : index
    %9 = vector.load %arg10[%c0_5, %c0_6] : memref<2x8xf32, #tpu.memory_space<vmem>>, vector<2x8xf32>
    %c0_7 = arith.constant 0 : index
    %c0_8 = arith.constant 0 : index
    %c0_9 = arith.constant 0 : index
    %10 = vector.load %arg6[%c0_7, %c0_8, %c0_9] : memref<2x8x24xf32, #tpu.memory_space<vmem>>, vector<1x8x24xf32>
    %11 = vector.shape_cast %10 : vector<1x8x24xf32> to vector<8x24xf32>
    %cst = arith.constant dense<0.000000e+00> : vector<2x24xf32>
    %12 = tpu.matmul %9, %11, %cst {dimension_numbers = #tpu.dot_dimension_numbers<[1], [0], [0], [1], [0, 0, 1, 1], [], []>} : vector<2x8xf32>, vector<8x24xf32>, vector<2x24xf32> -> vector<2x24xf32>
    %c0_10 = arith.constant 0 : index
    %c0_11 = arith.constant 0 : index
    %c0_12 = arith.constant 0 : index
    %13 = vector.load %arg7[%c0_10, %c0_11, %c0_12] : memref<2x1x24xf32, #tpu.memory_space<vmem>>, vector<1x1x24xf32>
    %14 = vector.shape_cast %13 : vector<1x1x24xf32> to vector<1x24xf32>
    %15 = vector.broadcast %14 : vector<1x24xf32> to vector<2x24xf32>
    %16 = arith.addf %12, %15 : vector<2x24xf32>
    %17 = vector.extract_strided_slice %8 {offsets = [0, 0], sizes = [2, 8], strides = [1, 1]} : vector<2x24xf32> to vector<2x8xf32>
    %18 = vector.extract_strided_slice %8 {offsets = [0, 8], sizes = [2, 8], strides = [1, 1]} : vector<2x24xf32> to vector<2x8xf32>
    %19 = vector.extract_strided_slice %8 {offsets = [0, 16], sizes = [2, 8], strides = [1, 1]} : vector<2x24xf32> to vector<2x8xf32>
    %20 = vector.extract_strided_slice %16 {offsets = [0, 0], sizes = [2, 8], strides = [1, 1]} : vector<2x24xf32> to vector<2x8xf32>
    %21 = vector.extract_strided_slice %16 {offsets = [0, 8], sizes = [2, 8], strides = [1, 1]} : vector<2x24xf32> to vector<2x8xf32>
    %22 = vector.extract_strided_slice %16 {offsets = [0, 16], sizes = [2, 8], strides = [1, 1]} : vector<2x24xf32> to vector<2x8xf32>
    %23 = arith.addf %17, %20 : vector<2x8xf32>
    %24 = arith.negf %23 : vector<2x8xf32>
    %25 = math.exp %24 : vector<2x8xf32>
    %cst_13 = arith.constant 1.000000e+00 : f32
    %26 = vector.broadcast %cst_13 : f32 to vector<2x8xf32>
    %27 = arith.addf %26, %25 : vector<2x8xf32>
    %28 = arith.divf %26, %27 : vector<2x8xf32>
    %29 = arith.addf %18, %21 : vector<2x8xf32>
    %30 = arith.negf %29 : vector<2x8xf32>
    %31 = math.exp %30 : vector<2x8xf32>
    %cst_14 = arith.constant 1.000000e+00 : f32
    %32 = vector.broadcast %cst_14 : f32 to vector<2x8xf32>
    %33 = arith.addf %32, %31 : vector<2x8xf32>
    %34 = arith.divf %32, %33 : vector<2x8xf32>
    %35 = arith.mulf %28, %22 : vector<2x8xf32>
    %36 = arith.addf %19, %35 : vector<2x8xf32>
    %37 = math.tanh %36 : vector<2x8xf32>
    %cst_15 = arith.constant 1.000000e+00 : f32
    %38 = vector.broadcast %cst_15 : f32 to vector<2x8xf32>
    %39 = arith.subf %38, %34 : vector<2x8xf32>
    %40 = arith.mulf %39, %37 : vector<2x8xf32>
    %41 = arith.mulf %34, %9 : vector<2x8xf32>
    %42 = arith.addf %40, %41 : vector<2x8xf32>
    %c0_16 = arith.constant 0 : index
    %c0_17 = arith.constant 0 : index
    %c0_18 = arith.constant 0 : index
    %43 = vector.load %arg3[%c0_16, %c0_17, %c0_18] : memref<1x2x1xf32, #tpu.memory_space<vmem>>, vector<1x2x1xf32>
    %44 = vector.shape_cast %43 : vector<1x2x1xf32> to vector<2x1xf32>
    %45 = vector.broadcast %44 : vector<2x1xf32> to vector<2x8xf32>
    %46 = arith.mulf %45, %42 : vector<2x8xf32>
    %cst_19 = arith.constant 1.000000e+00 : f32
    %47 = vector.broadcast %cst_19 : f32 to vector<2x1xf32>
    %48 = arith.subf %47, %44 : vector<2x1xf32>
    %49 = vector.broadcast %48 : vector<2x1xf32> to vector<2x8xf32>
    %50 = arith.mulf %49, %9 : vector<2x8xf32>
    %51 = arith.addf %46, %50 : vector<2x8xf32>
    %c0_20 = arith.constant 0 : index
    %c0_21 = arith.constant 0 : index
    %52 = vector.load %arg10[%c0_20, %c0_21] : memref<2x8xf32, #tpu.memory_space<vmem>>, vector<2x8xf32>
    tpu.vector_store %arg10[%c0_20, %c0_21], %51 {strides = array<i32>} : memref<2x8xf32, #tpu.memory_space<vmem>>, vector<2x8xf32>,
    %53 = vector.broadcast %44 : vector<2x1xf32> to vector<2x8xf32>
    %54 = arith.mulf %53, %51 : vector<2x8xf32>
    %c0_22 = arith.constant 0 : index
    %c0_23 = arith.constant 0 : index
    %c0_24 = arith.constant 0 : index
    %55 = vector.load %arg8[%c0_22, %c0_23, %c0_24] : memref<1x2x8xf32, #tpu.memory_space<vmem>>, vector<1x2x8xf32>
    %56 = vector.shape_cast %55 : vector<1x2x8xf32> to vector<2x8xf32>
    %57 = vector.shape_cast %54 : vector<2x8xf32> to vector<1x2x8xf32>
    tpu.vector_store %arg8[%c0_22, %c0_23, %c0_24], %57 {strides = array<i32>} : memref<1x2x8xf32, #tpu.memory_space<vmem>>, vector<1x2x8xf32>,
    %c0_25 = arith.constant 0 : index
    %c0_26 = arith.constant 0 : index
    %c0_27 = arith.constant 0 : index
    %58 = vector.load %arg2[%c0_25, %c0_26, %c0_27] : memref<1x2x48xf32, #tpu.memory_space<vmem>>, vector<1x2x48xf32>
    %59 = vector.shape_cast %58 : vector<1x2x48xf32> to vector<2x48xf32>
    %60 = vector.extract_strided_slice %59 {offsets = [0, 24], sizes = [2, 24], strides = [1, 1]} : vector<2x48xf32> to vector<2x24xf32>
    %c0_28 = arith.constant 0 : index
    %c0_29 = arith.constant 0 : index
    %61 = vector.load %arg5[%c0_28, %c0_29] : memref<2x48xf32, #tpu.memory_space<vmem>>, vector<2x48xf32>
    %62 = vector.extract_strided_slice %61 {offsets = [0, 24], sizes = [2, 24], strides = [1, 1]} : vector<2x48xf32> to vector<2x24xf32>
    %63 = arith.addf %60, %62 : vector<2x24xf32>
    %c0_30 = arith.constant 0 : index
    %c0_31 = arith.constant 0 : index
    %64 = vector.load %arg11[%c0_30, %c0_31] : memref<2x8xf32, #tpu.memory_space<vmem>>, vector<2x8xf32>
    %c1 = arith.constant 1 : index
    %c0_32 = arith.constant 0 : index
    %c0_33 = arith.constant 0 : index
    %65 = vector.load %arg6[%c1, %c0_32, %c0_33] : memref<2x8x24xf32, #tpu.memory_space<vmem>>, vector<1x8x24xf32>
    %66 = vector.shape_cast %65 : vector<1x8x24xf32> to vector<8x24xf32>
    %cst_34 = arith.constant dense<0.000000e+00> : vector<2x24xf32>
    %67 = tpu.matmul %64, %66, %cst_34 {dimension_numbers = #tpu.dot_dimension_numbers<[1], [0], [0], [1], [0, 0, 1, 1], [], []>} : vector<2x8xf32>, vector<8x24xf32>, vector<2x24xf32> -> vector<2x24xf32>
    %c1_35 = arith.constant 1 : index
    %c0_36 = arith.constant 0 : index
    %c0_37 = arith.constant 0 : index
    %68 = vector.load %arg7[%c1_35, %c0_36, %c0_37] : memref<2x1x24xf32, #tpu.memory_space<vmem>>, vector<1x1x24xf32>
    %69 = vector.shape_cast %68 : vector<1x1x24xf32> to vector<1x24xf32>
    %70 = vector.broadcast %69 : vector<1x24xf32> to vector<2x24xf32>
    %71 = arith.addf %67, %70 : vector<2x24xf32>
    %72 = vector.extract_strided_slice %63 {offsets = [0, 0], sizes = [2, 8], strides = [1, 1]} : vector<2x24xf32> to vector<2x8xf32>
    %73 = vector.extract_strided_slice %63 {offsets = [0, 8], sizes = [2, 8], strides = [1, 1]} : vector<2x24xf32> to vector<2x8xf32>
    %74 = vector.extract_strided_slice %63 {offsets = [0, 16], sizes = [2, 8], strides = [1, 1]} : vector<2x24xf32> to vector<2x8xf32>
    %75 = vector.extract_strided_slice %71 {offsets = [0, 0], sizes = [2, 8], strides = [1, 1]} : vector<2x24xf32> to vector<2x8xf32>
    %76 = vector.extract_strided_slice %71 {offsets = [0, 8], sizes = [2, 8], strides = [1, 1]} : vector<2x24xf32> to vector<2x8xf32>
    %77 = vector.extract_strided_slice %71 {offsets = [0, 16], sizes = [2, 8], strides = [1, 1]} : vector<2x24xf32> to vector<2x8xf32>
    %78 = arith.addf %72, %75 : vector<2x8xf32>
    %79 = arith.negf %78 : vector<2x8xf32>
    %80 = math.exp %79 : vector<2x8xf32>
    %cst_38 = arith.constant 1.000000e+00 : f32
    %81 = vector.broadcast %cst_38 : f32 to vector<2x8xf32>
    %82 = arith.addf %81, %80 : vector<2x8xf32>
    %83 = arith.divf %81, %82 : vector<2x8xf32>
    %84 = arith.addf %73, %76 : vector<2x8xf32>
    %85 = arith.negf %84 : vector<2x8xf32>
    %86 = math.exp %85 : vector<2x8xf32>
    %cst_39 = arith.constant 1.000000e+00 : f32
    %87 = vector.broadcast %cst_39 : f32 to vector<2x8xf32>
    %88 = arith.addf %87, %86 : vector<2x8xf32>
    %89 = arith.divf %87, %88 : vector<2x8xf32>
    %90 = arith.mulf %83, %77 : vector<2x8xf32>
    %91 = arith.addf %74, %90 : vector<2x8xf32>
    %92 = math.tanh %91 : vector<2x8xf32>
    %cst_40 = arith.constant 1.000000e+00 : f32
    %93 = vector.broadcast %cst_40 : f32 to vector<2x8xf32>
    %94 = arith.subf %93, %89 : vector<2x8xf32>
    %95 = arith.mulf %94, %92 : vector<2x8xf32>
    %96 = arith.mulf %89, %64 : vector<2x8xf32>
    %97 = arith.addf %95, %96 : vector<2x8xf32>
    %c0_41 = arith.constant 0 : index
    %c0_42 = arith.constant 0 : index
    %c0_43 = arith.constant 0 : index
    %98 = vector.load %arg4[%c0_41, %c0_42, %c0_43] : memref<1x2x1xf32, #tpu.memory_space<vmem>>, vector<1x2x1xf32>
    %99 = vector.shape_cast %98 : vector<1x2x1xf32> to vector<2x1xf32>
    %100 = vector.broadcast %99 : vector<2x1xf32> to vector<2x8xf32>
    %101 = arith.mulf %100, %97 : vector<2x8xf32>
    %cst_44 = arith.constant 1.000000e+00 : f32
    %102 = vector.broadcast %cst_44 : f32 to vector<2x1xf32>
    %103 = arith.subf %102, %99 : vector<2x1xf32>
    %104 = vector.broadcast %103 : vector<2x1xf32> to vector<2x8xf32>
    %105 = arith.mulf %104, %64 : vector<2x8xf32>
    %106 = arith.addf %101, %105 : vector<2x8xf32>
    %c0_45 = arith.constant 0 : index
    %c0_46 = arith.constant 0 : index
    %107 = vector.load %arg11[%c0_45, %c0_46] : memref<2x8xf32, #tpu.memory_space<vmem>>, vector<2x8xf32>
    tpu.vector_store %arg11[%c0_45, %c0_46], %106 {strides = array<i32>} : memref<2x8xf32, #tpu.memory_space<vmem>>, vector<2x8xf32>,
    %108 = vector.broadcast %99 : vector<2x1xf32> to vector<2x8xf32>
    %109 = arith.mulf %108, %106 : vector<2x8xf32>
    %c0_47 = arith.constant 0 : index
    %c0_48 = arith.constant 0 : index
    %c0_49 = arith.constant 0 : index
    %110 = vector.load %arg9[%c0_47, %c0_48, %c0_49] : memref<1x2x8xf32, #tpu.memory_space<vmem>>, vector<1x2x8xf32>
    %111 = vector.shape_cast %110 : vector<1x2x8xf32> to vector<2x8xf32>
    %112 = vector.shape_cast %109 : vector<2x8xf32> to vector<1x2x8xf32>
    tpu.vector_store %arg9[%c0_47, %c0_48, %c0_49], %112 {strides = array<i32>} : memref<1x2x8xf32, #tpu.memory_space<vmem>>, vector<1x2x8xf32>,
    return
  }
  func.func @transform_0(%arg0: i32) -> (i32, i32, i32) {
    %c0_i32 = arith.constant 0 : i32
    %c0_i32_0 = arith.constant 0 : i32
    %c0_i32_1 = arith.constant 0 : i32
    return %arg0, %c0_i32, %c0_i32_0 : i32, i32, i32
  }
  func.func @transform_1(%arg0: i32) -> (i32, i32, i32) {
    %c5_i32 = arith.constant 5 : i32
    %0 = arith.subi %c5_i32, %arg0 : i32
    %c0_i32 = arith.constant 0 : i32
    %c0_i32_0 = arith.constant 0 : i32
    %c0_i32_1 = arith.constant 0 : i32
    return %0, %c0_i32, %c0_i32_0 : i32, i32, i32
  }
  func.func @transform_2(%arg0: i32) -> (i32, i32, i32) {
    %c0_i32 = arith.constant 0 : i32
    %c0_i32_0 = arith.constant 0 : i32
    %c0_i32_1 = arith.constant 0 : i32
    return %arg0, %c0_i32, %c0_i32_0 : i32, i32, i32
  }
  func.func @transform_3(%arg0: i32) -> (i32, i32, i32) {
    %c5_i32 = arith.constant 5 : i32
    %0 = arith.subi %c5_i32, %arg0 : i32
    %c0_i32 = arith.constant 0 : i32
    %c0_i32_0 = arith.constant 0 : i32
    %c0_i32_1 = arith.constant 0 : i32
    return %0, %c0_i32, %c0_i32_0 : i32, i32, i32
  }
  func.func @transform_4(%arg0: i32) -> (i32, i32) {
    %c0_i32 = arith.constant 0 : i32
    %c0_i32_0 = arith.constant 0 : i32
    %c0_i32_1 = arith.constant 0 : i32
    return %c0_i32, %c0_i32_0 : i32, i32
  }
  func.func @transform_5(%arg0: i32) -> (i32, i32, i32) {
    %c0_i32 = arith.constant 0 : i32
    %c0_i32_0 = arith.constant 0 : i32
    %c0_i32_1 = arith.constant 0 : i32
    %c0_i32_2 = arith.constant 0 : i32
    return %c0_i32, %c0_i32_0, %c0_i32_1 : i32, i32, i32
  }
  func.func @transform_6(%arg0: i32) -> (i32, i32, i32) {
    %c0_i32 = arith.constant 0 : i32
    %c0_i32_0 = arith.constant 0 : i32
    %c0_i32_1 = arith.constant 0 : i32
    %c0_i32_2 = arith.constant 0 : i32
    return %c0_i32, %c0_i32_0, %c0_i32_1 : i32, i32, i32
  }
  func.func @transform_7(%arg0: i32) -> (i32, i32, i32) {
    %c0_i32 = arith.constant 0 : i32
    %c0_i32_0 = arith.constant 0 : i32
    %c0_i32_1 = arith.constant 0 : i32
    return %arg0, %c0_i32, %c0_i32_0 : i32, i32, i32
  }
  func.func @transform_8(%arg0: i32) -> (i32, i32, i32) {
    %c5_i32 = arith.constant 5 : i32
    %0 = arith.subi %c5_i32, %arg0 : i32
    %c0_i32 = arith.constant 0 : i32
    %c0_i32_0 = arith.constant 0 : i32
    %c0_i32_1 = arith.constant 0 : i32
    return %0, %c0_i32, %c0_i32_0 : i32, i32, i32
  }
}

module attributes {stable_mosaic.version = 11 : i64} {
  func.func @_attn_mean_kernel(%arg0: i32, %arg1: memref<1x6x16xf32, #tpu.memory_space<vmem>>, %arg2: memref<1x1x6xf32, #tpu.memory_space<vmem>>, %arg3: memref<1x6x1xf32, #tpu.memory_space<vmem>>, %arg4: memref<16x16xf32, #tpu.memory_space<vmem>>, %arg5: memref<1x16xf32, #tpu.memory_space<vmem>>, %arg6: memref<1x1x32xf32, #tpu.memory_space<vmem>>) attributes {dimension_semantics = [#tpu.dimension_semantics<parallel>], iteration_bounds = array<i64: 2>, scalar_prefetch = 0 : i64, scratch_operands = 0 : i64, tpu.core_type = #tpu.core_type<tc>, window_params = [{transform_indices = @transform_0, window_bounds = array<i64: 1, 6, 16>}, {transform_indices = @transform_1, window_bounds = array<i64: 1, 1, 6>}, {transform_indices = @transform_2, window_bounds = array<i64: 1, 6, 1>}, {pipeline_mode = #tpu.pipeline_mode<synchronous>, transform_indices = @transform_3, window_bounds = array<i64: 16, 16>}, {pipeline_mode = #tpu.pipeline_mode<synchronous>, transform_indices = @transform_4, window_bounds = array<i64: 1, 16>}, {transform_indices = @transform_5, window_bounds = array<i64: 1, 1, 32>}]} {
    %c0 = arith.constant 0 : index
    %c0_0 = arith.constant 0 : index
    %c0_1 = arith.constant 0 : index
    %0 = vector.load %arg1[%c0, %c0_0, %c0_1] : memref<1x6x16xf32, #tpu.memory_space<vmem>>, vector<1x6x16xf32>
    %1 = vector.shape_cast %0 : vector<1x6x16xf32> to vector<6x16xf32>
    %c0_2 = arith.constant 0 : index
    %c0_3 = arith.constant 0 : index
    %c0_4 = arith.constant 0 : index
    %2 = vector.load %arg2[%c0_2, %c0_3, %c0_4] : memref<1x1x6xf32, #tpu.memory_space<vmem>>, vector<1x1x6xf32>
    %3 = vector.shape_cast %2 : vector<1x1x6xf32> to vector<1x6xf32>
    %c0_5 = arith.constant 0 : index
    %c0_6 = arith.constant 0 : index
    %c0_7 = arith.constant 0 : index
    %4 = vector.load %arg3[%c0_5, %c0_6, %c0_7] : memref<1x6x1xf32, #tpu.memory_space<vmem>>, vector<1x6x1xf32>
    %5 = vector.shape_cast %4 : vector<1x6x1xf32> to vector<6x1xf32>
    %6 = arith.truncf %1 : vector<6x16xf32> to vector<6x16xbf16>
    %c0_8 = arith.constant 0 : index
    %c0_9 = arith.constant 0 : index
    %7 = vector.load %arg4[%c0_8, %c0_9] : memref<16x16xf32, #tpu.memory_space<vmem>>, vector<16x16xf32>
    %8 = arith.truncf %7 : vector<16x16xf32> to vector<16x16xbf16>
    %cst = arith.constant dense<0.000000e+00> : vector<6x16xf32>
    %9 = tpu.matmul %6, %8, %cst {dimension_numbers = #tpu.dot_dimension_numbers<[1], [0], [0], [1], [0, 0, 1, 1], [], []>} : vector<6x16xbf16>, vector<16x16xbf16>, vector<6x16xf32> -> vector<6x16xf32>
    %c0_10 = arith.constant 0 : index
    %c0_11 = arith.constant 0 : index
    %10 = vector.load %arg5[%c0_10, %c0_11] : memref<1x16xf32, #tpu.memory_space<vmem>>, vector<1x16xf32>
    %11 = vector.broadcast %10 : vector<1x16xf32> to vector<6x16xf32>
    %12 = arith.addf %9, %11 : vector<6x16xf32>
    %13 = arith.truncf %12 : vector<6x16xf32> to vector<6x16xbf16>
    %cst_12 = arith.constant dense<0.000000e+00> : vector<6x6xf32>
    %14 = tpu.matmul %13, %6, %cst_12 {dimension_numbers = #tpu.dot_dimension_numbers<[1], [1], [0], [0], [0, 0, 1, 0], [], []>} : vector<6x16xbf16>, vector<6x16xbf16>, vector<6x6xf32> -> vector<6x6xf32>
    %cst_13 = arith.constant 5.000000e-01 : f32
    %15 = vector.broadcast %cst_13 : f32 to vector<1x6xf32>
    %16 = arith.cmpf ogt, %3, %15 : vector<1x6xf32>
    %cst_14 = arith.constant -1.000000e+30 : f32
    %17 = vector.shape_cast %16 : vector<1x6xi1> to vector<1x6xi1>
    %18 = vector.broadcast %17 : vector<1x6xi1> to vector<6x6xi1>
    %19 = vector.broadcast %cst_14 : f32 to vector<6x6xf32>
    %20 = arith.select %18, %14, %19 : vector<6x6xi1>, vector<6x6xf32>
    %cst_15 = arith.constant dense<0xFF800000> : vector<6xf32>
    %21 = vector.multi_reduction <maximumf>, %20, %cst_15 [1] : vector<6x6xf32> to vector<6xf32>
    %22 = vector.shape_cast %21 : vector<6xf32> to vector<6x1xf32>
    %23 = vector.broadcast %22 : vector<6x1xf32> to vector<6x6xf32>
    %24 = arith.subf %20, %23 : vector<6x6xf32>
    %25 = math.exp %24 : vector<6x6xf32>
    %cst_16 = arith.constant dense<0.000000e+00> : vector<6xf32>
    %26 = vector.multi_reduction <add>, %25, %cst_16 [1] : vector<6x6xf32> to vector<6xf32>
    %27 = vector.shape_cast %26 : vector<6xf32> to vector<6x1xf32>
    %28 = tpu.reciprocal %27 {approx = true} : vector<6x1xf32> -> vector<6x1xf32>
    %29 = vector.broadcast %28 : vector<6x1xf32> to vector<6x6xf32>
    %30 = arith.mulf %25, %29 : vector<6x6xf32>
    %31 = arith.truncf %30 : vector<6x6xf32> to vector<6x6xbf16>
    %cst_17 = arith.constant dense<0.000000e+00> : vector<6x16xf32>
    %32 = tpu.matmul %31, %6, %cst_17 {dimension_numbers = #tpu.dot_dimension_numbers<[1], [0], [0], [1], [0, 0, 1, 1], [], []>} : vector<6x6xbf16>, vector<6x16xbf16>, vector<6x16xf32> -> vector<6x16xf32>
    %cst_18 = arith.constant dense<0.000000e+00> : vector<1xf32>
    %33 = vector.multi_reduction <add>, %5, %cst_18 [0] : vector<6x1xf32> to vector<1xf32>
    %34 = vector.shape_cast %33 : vector<1xf32> to vector<1x1xf32>
    %cst_19 = arith.constant 1.000000e+00 : f32
    %35 = vector.broadcast %cst_19 : f32 to vector<1x1xf32>
    %36 = arith.divf %35, %34 : vector<1x1xf32>
    %37 = vector.broadcast %5 : vector<6x1xf32> to vector<6x16xf32>
    %38 = arith.mulf %32, %37 : vector<6x16xf32>
    %cst_20 = arith.constant dense<0.000000e+00> : vector<16xf32>
    %39 = vector.multi_reduction <add>, %38, %cst_20 [0] : vector<6x16xf32> to vector<16xf32>
    %40 = vector.shape_cast %39 : vector<16xf32> to vector<1x16xf32>
    %41 = vector.broadcast %36 : vector<1x1xf32> to vector<1x16xf32>
    %42 = arith.mulf %40, %41 : vector<1x16xf32>
    %43 = vector.broadcast %5 : vector<6x1xf32> to vector<6x16xf32>
    %44 = arith.mulf %1, %43 : vector<6x16xf32>
    %cst_21 = arith.constant dense<0.000000e+00> : vector<16xf32>
    %45 = vector.multi_reduction <add>, %44, %cst_21 [0] : vector<6x16xf32> to vector<16xf32>
    %46 = vector.shape_cast %45 : vector<16xf32> to vector<1x16xf32>
    %47 = vector.broadcast %36 : vector<1x1xf32> to vector<1x16xf32>
    %48 = arith.mulf %46, %47 : vector<1x16xf32>
    %49 = tpu.concatenate %42, %48 in 1 : vector<1x16xf32>, vector<1x16xf32> -> vector<1x32xf32>
    %c0_22 = arith.constant 0 : index
    %c0_23 = arith.constant 0 : index
    %c0_24 = arith.constant 0 : index
    %50 = vector.load %arg6[%c0_22, %c0_23, %c0_24] : memref<1x1x32xf32, #tpu.memory_space<vmem>>, vector<1x1x32xf32>
    %51 = vector.shape_cast %50 : vector<1x1x32xf32> to vector<1x32xf32>
    %52 = vector.shape_cast %49 : vector<1x32xf32> to vector<1x1x32xf32>
    tpu.vector_store %arg6[%c0_22, %c0_23, %c0_24], %52 {strides = array<i32>} : memref<1x1x32xf32, #tpu.memory_space<vmem>>, vector<1x1x32xf32>,
    return
  }
  func.func @transform_0(%arg0: i32) -> (i32, i32, i32) {
    %c0_i32 = arith.constant 0 : i32
    %c0_i32_0 = arith.constant 0 : i32
    %c0_i32_1 = arith.constant 0 : i32
    return %arg0, %c0_i32, %c0_i32_0 : i32, i32, i32
  }
  func.func @transform_1(%arg0: i32) -> (i32, i32, i32) {
    %c0_i32 = arith.constant 0 : i32
    %c0_i32_0 = arith.constant 0 : i32
    %c0_i32_1 = arith.constant 0 : i32
    return %arg0, %c0_i32, %c0_i32_0 : i32, i32, i32
  }
  func.func @transform_2(%arg0: i32) -> (i32, i32, i32) {
    %c0_i32 = arith.constant 0 : i32
    %c0_i32_0 = arith.constant 0 : i32
    %c0_i32_1 = arith.constant 0 : i32
    return %arg0, %c0_i32, %c0_i32_0 : i32, i32, i32
  }
  func.func @transform_3(%arg0: i32) -> (i32, i32) {
    %c0_i32 = arith.constant 0 : i32
    %c0_i32_0 = arith.constant 0 : i32
    %c0_i32_1 = arith.constant 0 : i32
    return %c0_i32, %c0_i32_0 : i32, i32
  }
  func.func @transform_4(%arg0: i32) -> (i32, i32) {
    %c0_i32 = arith.constant 0 : i32
    %c0_i32_0 = arith.constant 0 : i32
    %c0_i32_1 = arith.constant 0 : i32
    return %c0_i32, %c0_i32_0 : i32, i32
  }
  func.func @transform_5(%arg0: i32) -> (i32, i32, i32) {
    %c0_i32 = arith.constant 0 : i32
    %c0_i32_0 = arith.constant 0 : i32
    %c0_i32_1 = arith.constant 0 : i32
    return %arg0, %c0_i32, %c0_i32_0 : i32, i32, i32
  }
}

module attributes {stable_mosaic.version = 11 : i64} {
  func.func @_bigru_step_kernel(%arg0: i32, %arg1: memref<1x2x48xf32, #tpu.memory_space<vmem>>, %arg2: memref<1x2x48xf32, #tpu.memory_space<vmem>>, %arg3: memref<1x2x1xf32, #tpu.memory_space<vmem>>, %arg4: memref<1x2x1xf32, #tpu.memory_space<vmem>>, %arg5: memref<2x48xf32, #tpu.memory_space<vmem>>, %arg6: memref<2x8x24xf32, #tpu.memory_space<vmem>>, %arg7: memref<2x1x24xf32, #tpu.memory_space<vmem>>, %arg8: memref<1x2x8xf32, #tpu.memory_space<vmem>>, %arg9: memref<1x2x8xf32, #tpu.memory_space<vmem>>, %arg10: memref<2x8xf32, #tpu.memory_space<vmem>>, %arg11: memref<2x8xf32, #tpu.memory_space<vmem>>) attributes {dimension_semantics = [#tpu.dimension_semantics<arbitrary>], iteration_bounds = array<i64: 8>, scalar_prefetch = 0 : i64, scratch_operands = 2 : i64, tpu.core_type = #tpu.core_type<tc>, window_params = [{transform_indices = @transform_0, window_bounds = array<i64: 1, 2, 48>}, {transform_indices = @transform_1, window_bounds = array<i64: 1, 2, 48>}, {transform_indices = @transform_2, window_bounds = array<i64: 1, 2, 1>}, {transform_indices = @transform_3, window_bounds = array<i64: 1, 2, 1>}, {pipeline_mode = #tpu.pipeline_mode<synchronous>, transform_indices = @transform_4, window_bounds = array<i64: 2, 48>}, {pipeline_mode = #tpu.pipeline_mode<synchronous>, transform_indices = @transform_5, window_bounds = array<i64: 2, 8, 24>}, {pipeline_mode = #tpu.pipeline_mode<synchronous>, transform_indices = @transform_6, window_bounds = array<i64: 2, 1, 24>}, {transform_indices = @transform_7, window_bounds = array<i64: 1, 2, 8>}, {transform_indices = @transform_8, window_bounds = array<i64: 1, 2, 8>}]} {
    %c0_i32 = arith.constant 0 : i32
    %0 = arith.cmpi eq, %arg0, %c0_i32 : i32
    %1 = arith.extui %0 : i1 to i32
    %c0_i32_0 = arith.constant 0 : i32
    %2 = arith.cmpi ne, %1, %c0_i32_0 : i32
    scf.if %2 {
      %cst_50 = arith.constant 0.000000e+00 : f32
      %113 = vector.broadcast %cst_50 : f32 to vector<2x8xf32>
      %c0_51 = arith.constant 0 : index
      %c0_52 = arith.constant 0 : index
      %114 = vector.load %arg10[%c0_51, %c0_52] : memref<2x8xf32, #tpu.memory_space<vmem>>, vector<2x8xf32>
      tpu.vector_store %arg10[%c0_51, %c0_52], %113 {strides = array<i32>} : memref<2x8xf32, #tpu.memory_space<vmem>>, vector<2x8xf32>,
      %cst_53 = arith.constant 0.000000e+00 : f32
      %115 = vector.broadcast %cst_53 : f32 to vector<2x8xf32>
      %c0_54 = arith.constant 0 : index
      %c0_55 = arith.constant 0 : index
      %116 = vector.load %arg11[%c0_54, %c0_55] : memref<2x8xf32, #tpu.memory_space<vmem>>, vector<2x8xf32>
      tpu.vector_store %arg11[%c0_54, %c0_55], %115 {strides = array<i32>} : memref<2x8xf32, #tpu.memory_space<vmem>>, vector<2x8xf32>,
    } else {
    }
    %c0 = arith.constant 0 : index
    %c0_1 = arith.constant 0 : index
    %c0_2 = arith.constant 0 : index
    %3 = vector.load %arg1[%c0, %c0_1, %c0_2] : memref<1x2x48xf32, #tpu.memory_space<vmem>>, vector<1x2x48xf32>
    %4 = vector.shape_cast %3 : vector<1x2x48xf32> to vector<2x48xf32>
    %5 = vector.extract_strided_slice %4 {offsets = [0, 0], sizes = [2, 24], strides = [1, 1]} : vector<2x48xf32> to vector<2x24xf32>
    %c0_3 = arith.constant 0 : index
    %c0_4 = arith.constant 0 : index
    %6 = vector.load %arg5[%c0_3, %c0_4] : memref<2x48xf32, #tpu.memory_space<vmem>>, vector<2x48xf32>
    %7 = vector.extract_strided_slice %6 {offsets = [0, 0], sizes = [2, 24], strides = [1, 1]} : vector<2x48xf32> to vector<2x24xf32>
    %8 = arith.addf %5, %7 : vector<2x24xf32>
    %c0_5 = arith.constant 0 : index
    %c0_6 = arith.constant 0 : index
    %9 = vector.load %arg10[%c0_5, %c0_6] : memref<2x8xf32, #tpu.memory_space<vmem>>, vector<2x8xf32>
    %c0_7 = arith.constant 0 : index
    %c0_8 = arith.constant 0 : index
    %c0_9 = arith.constant 0 : index
    %10 = vector.load %arg6[%c0_7, %c0_8, %c0_9] : memref<2x8x24xf32, #tpu.memory_space<vmem>>, vector<1x8x24xf32>
    %11 = vector.shape_cast %10 : vector<1x8x24xf32> to vector<8x24xf32>
    %cst = arith.constant dense<0.000000e+00> : vector<2x24xf32>
    %12 = tpu.matmul %9, %11, %cst {dimension_numbers = #tpu.dot_dimension_numbers<[1], [0], [0], [1], [0, 0, 1, 1], [], []>} : vector<2x8xf32>, vector<8x24xf32>, vector<2x24xf32> -> vector<2x24xf32>
    %c0_10 = arith.constant 0 : index
    %c0_11 = arith.constant 0 : index
    %c0_12 = arith.constant 0 : index
    %13 = vector.load %arg7[%c0_10, %c0_11, %c0_12] : memref<2x1x24xf32, #tpu.memory_space<vmem>>, vector<1x1x24xf32>
    %14 = vector.shape_cast %13 : vector<1x1x24xf32> to vector<1x24xf32>
    %15 = vector.broadcast %14 : vector<1x24xf32> to vector<2x24xf32>
    %16 = arith.addf %12, %15 : vector<2x24xf32>
    %17 = vector.extract_strided_slice %8 {offsets = [0, 0], sizes = [2, 8], strides = [1, 1]} : vector<2x24xf32> to vector<2x8xf32>
    %18 = vector.extract_strided_slice %8 {offsets = [0, 8], sizes = [2, 8], strides = [1, 1]} : vector<2x24xf32> to vector<2x8xf32>
    %19 = vector.extract_strided_slice %8 {offsets = [0, 16], sizes = [2, 8], strides = [1, 1]} : vector<2x24xf32> to vector<2x8xf32>
    %20 = vector.extract_strided_slice %16 {offsets = [0, 0], sizes = [2, 8], strides = [1, 1]} : vector<2x24xf32> to vector<2x8xf32>
    %21 = vector.extract_strided_slice %16 {offsets = [0, 8], sizes = [2, 8], strides = [1, 1]} : vector<2x24xf32> to vector<2x8xf32>
    %22 = vector.extract_strided_slice %16 {offsets = [0, 16], sizes = [2, 8], strides = [1, 1]} : vector<2x24xf32> to vector<2x8xf32>
    %23 = arith.addf %17, %20 : vector<2x8xf32>
    %24 = arith.negf %23 : vector<2x8xf32>
    %25 = math.exp %24 : vector<2x8xf32>
    %cst_13 = arith.constant 1.000000e+00 : f32
    %26 = vector.broadcast %cst_13 : f32 to vector<2x8xf32>
    %27 = arith.addf %26, %25 : vector<2x8xf32>
    %28 = arith.divf %26, %27 : vector<2x8xf32>
    %29 = arith.addf %18, %21 : vector<2x8xf32>
    %30 = arith.negf %29 : vector<2x8xf32>
    %31 = math.exp %30 : vector<2x8xf32>
    %cst_14 = arith.constant 1.000000e+00 : f32
    %32 = vector.broadcast %cst_14 : f32 to vector<2x8xf32>
    %33 = arith.addf %32, %31 : vector<2x8xf32>
    %34 = arith.divf %32, %33 : vector<2x8xf32>
    %35 = arith.mulf %28, %22 : vector<2x8xf32>
    %36 = arith.addf %19, %35 : vector<2x8xf32>
    %37 = math.tanh %36 : vector<2x8xf32>
    %cst_15 = arith.constant 1.000000e+00 : f32
    %38 = vector.broadcast %cst_15 : f32 to vector<2x8xf32>
    %39 = arith.subf %38, %34 : vector<2x8xf32>
    %40 = arith.mulf %39, %37 : vector<2x8xf32>
    %41 = arith.mulf %34, %9 : vector<2x8xf32>
    %42 = arith.addf %40, %41 : vector<2x8xf32>
    %c0_16 = arith.constant 0 : index
    %c0_17 = arith.constant 0 : index
    %c0_18 = arith.constant 0 : index
    %43 = vector.load %arg3[%c0_16, %c0_17, %c0_18] : memref<1x2x1xf32, #tpu.memory_space<vmem>>, vector<1x2x1xf32>
    %44 = vector.shape_cast %43 : vector<1x2x1xf32> to vector<2x1xf32>
    %45 = vector.broadcast %44 : vector<2x1xf32> to vector<2x8xf32>
    %46 = arith.mulf %45, %42 : vector<2x8xf32>
    %cst_19 = arith.constant 1.000000e+00 : f32
    %47 = vector.broadcast %cst_19 : f32 to vector<2x1xf32>
    %48 = arith.subf %47, %44 : vector<2x1xf32>
    %49 = vector.broadcast %48 : vector<2x1xf32> to vector<2x8xf32>
    %50 = arith.mulf %49, %9 : vector<2x8xf32>
    %51 = arith.addf %46, %50 : vector<2x8xf32>
    %c0_20 = arith.constant 0 : index
    %c0_21 = arith.constant 0 : index
    %52 = vector.load %arg10[%c0_20, %c0_21] : memref<2x8xf32, #tpu.memory_space<vmem>>, vector<2x8xf32>
    tpu.vector_store %arg10[%c0_20, %c0_21], %51 {strides = array<i32>} : memref<2x8xf32, #tpu.memory_space<vmem>>, vector<2x8xf32>,
    %53 = vector.broadcast %44 : vector<2x1xf32> to vector<2x8xf32>
    %54 = arith.mulf %53, %51 : vector<2x8xf32>
    %c0_22 = arith.constant 0 : index
    %c0_23 = arith.constant 0 : index
    %c0_24 = arith.constant 0 : index
    %55 = vector.load %arg8[%c0_22, %c0_23, %c0_24] : memref<1x2x8xf32, #tpu.memory_space<vmem>>, vector<1x2x8xf32>
    %56 = vector.shape_cast %55 : vector<1x2x8xf32> to vector<2x8xf32>
    %57 = vector.shape_cast %54 : vector<2x8xf32> to vector<1x2x8xf32>
    tpu.vector_store %arg8[%c0_22, %c0_23, %c0_24], %57 {strides = array<i32>} : memref<1x2x8xf32, #tpu.memory_space<vmem>>, vector<1x2x8xf32>,
    %c0_25 = arith.constant 0 : index
    %c0_26 = arith.constant 0 : index
    %c0_27 = arith.constant 0 : index
    %58 = vector.load %arg2[%c0_25, %c0_26, %c0_27] : memref<1x2x48xf32, #tpu.memory_space<vmem>>, vector<1x2x48xf32>
    %59 = vector.shape_cast %58 : vector<1x2x48xf32> to vector<2x48xf32>
    %60 = vector.extract_strided_slice %59 {offsets = [0, 24], sizes = [2, 24], strides = [1, 1]} : vector<2x48xf32> to vector<2x24xf32>
    %c0_28 = arith.constant 0 : index
    %c0_29 = arith.constant 0 : index
    %61 = vector.load %arg5[%c0_28, %c0_29] : memref<2x48xf32, #tpu.memory_space<vmem>>, vector<2x48xf32>
    %62 = vector.extract_strided_slice %61 {offsets = [0, 24], sizes = [2, 24], strides = [1, 1]} : vector<2x48xf32> to vector<2x24xf32>
    %63 = arith.addf %60, %62 : vector<2x24xf32>
    %c0_30 = arith.constant 0 : index
    %c0_31 = arith.constant 0 : index
    %64 = vector.load %arg11[%c0_30, %c0_31] : memref<2x8xf32, #tpu.memory_space<vmem>>, vector<2x8xf32>
    %c1 = arith.constant 1 : index
    %c0_32 = arith.constant 0 : index
    %c0_33 = arith.constant 0 : index
    %65 = vector.load %arg6[%c1, %c0_32, %c0_33] : memref<2x8x24xf32, #tpu.memory_space<vmem>>, vector<1x8x24xf32>
    %66 = vector.shape_cast %65 : vector<1x8x24xf32> to vector<8x24xf32>
    %cst_34 = arith.constant dense<0.000000e+00> : vector<2x24xf32>
    %67 = tpu.matmul %64, %66, %cst_34 {dimension_numbers = #tpu.dot_dimension_numbers<[1], [0], [0], [1], [0, 0, 1, 1], [], []>} : vector<2x8xf32>, vector<8x24xf32>, vector<2x24xf32> -> vector<2x24xf32>
    %c1_35 = arith.constant 1 : index
    %c0_36 = arith.constant 0 : index
    %c0_37 = arith.constant 0 : index
    %68 = vector.load %arg7[%c1_35, %c0_36, %c0_37] : memref<2x1x24xf32, #tpu.memory_space<vmem>>, vector<1x1x24xf32>
    %69 = vector.shape_cast %68 : vector<1x1x24xf32> to vector<1x24xf32>
    %70 = vector.broadcast %69 : vector<1x24xf32> to vector<2x24xf32>
    %71 = arith.addf %67, %70 : vector<2x24xf32>
    %72 = vector.extract_strided_slice %63 {offsets = [0, 0], sizes = [2, 8], strides = [1, 1]} : vector<2x24xf32> to vector<2x8xf32>
    %73 = vector.extract_strided_slice %63 {offsets = [0, 8], sizes = [2, 8], strides = [1, 1]} : vector<2x24xf32> to vector<2x8xf32>
    %74 = vector.extract_strided_slice %63 {offsets = [0, 16], sizes = [2, 8], strides = [1, 1]} : vector<2x24xf32> to vector<2x8xf32>
    %75 = vector.extract_strided_slice %71 {offsets = [0, 0], sizes = [2, 8], strides = [1, 1]} : vector<2x24xf32> to vector<2x8xf32>
    %76 = vector.extract_strided_slice %71 {offsets = [0, 8], sizes = [2, 8], strides = [1, 1]} : vector<2x24xf32> to vector<2x8xf32>
    %77 = vector.extract_strided_slice %71 {offsets = [0, 16], sizes = [2, 8], strides = [1, 1]} : vector<2x24xf32> to vector<2x8xf32>
    %78 = arith.addf %72, %75 : vector<2x8xf32>
    %79 = arith.negf %78 : vector<2x8xf32>
    %80 = math.exp %79 : vector<2x8xf32>
    %cst_38 = arith.constant 1.000000e+00 : f32
    %81 = vector.broadcast %cst_38 : f32 to vector<2x8xf32>
    %82 = arith.addf %81, %80 : vector<2x8xf32>
    %83 = arith.divf %81, %82 : vector<2x8xf32>
    %84 = arith.addf %73, %76 : vector<2x8xf32>
    %85 = arith.negf %84 : vector<2x8xf32>
    %86 = math.exp %85 : vector<2x8xf32>
    %cst_39 = arith.constant 1.000000e+00 : f32
    %87 = vector.broadcast %cst_39 : f32 to vector<2x8xf32>
    %88 = arith.addf %87, %86 : vector<2x8xf32>
    %89 = arith.divf %87, %88 : vector<2x8xf32>
    %90 = arith.mulf %83, %77 : vector<2x8xf32>
    %91 = arith.addf %74, %90 : vector<2x8xf32>
    %92 = math.tanh %91 : vector<2x8xf32>
    %cst_40 = arith.constant 1.000000e+00 : f32
    %93 = vector.broadcast %cst_40 : f32 to vector<2x8xf32>
    %94 = arith.subf %93, %89 : vector<2x8xf32>
    %95 = arith.mulf %94, %92 : vector<2x8xf32>
    %96 = arith.mulf %89, %64 : vector<2x8xf32>
    %97 = arith.addf %95, %96 : vector<2x8xf32>
    %c0_41 = arith.constant 0 : index
    %c0_42 = arith.constant 0 : index
    %c0_43 = arith.constant 0 : index
    %98 = vector.load %arg4[%c0_41, %c0_42, %c0_43] : memref<1x2x1xf32, #tpu.memory_space<vmem>>, vector<1x2x1xf32>
    %99 = vector.shape_cast %98 : vector<1x2x1xf32> to vector<2x1xf32>
    %100 = vector.broadcast %99 : vector<2x1xf32> to vector<2x8xf32>
    %101 = arith.mulf %100, %97 : vector<2x8xf32>
    %cst_44 = arith.constant 1.000000e+00 : f32
    %102 = vector.broadcast %cst_44 : f32 to vector<2x1xf32>
    %103 = arith.subf %102, %99 : vector<2x1xf32>
    %104 = vector.broadcast %103 : vector<2x1xf32> to vector<2x8xf32>
    %105 = arith.mulf %104, %64 : vector<2x8xf32>
    %106 = arith.addf %101, %105 : vector<2x8xf32>
    %c0_45 = arith.constant 0 : index
    %c0_46 = arith.constant 0 : index
    %107 = vector.load %arg11[%c0_45, %c0_46] : memref<2x8xf32, #tpu.memory_space<vmem>>, vector<2x8xf32>
    tpu.vector_store %arg11[%c0_45, %c0_46], %106 {strides = array<i32>} : memref<2x8xf32, #tpu.memory_space<vmem>>, vector<2x8xf32>,
    %108 = vector.broadcast %99 : vector<2x1xf32> to vector<2x8xf32>
    %109 = arith.mulf %108, %106 : vector<2x8xf32>
    %c0_47 = arith.constant 0 : index
    %c0_48 = arith.constant 0 : index
    %c0_49 = arith.constant 0 : index
    %110 = vector.load %arg9[%c0_47, %c0_48, %c0_49] : memref<1x2x8xf32, #tpu.memory_space<vmem>>, vector<1x2x8xf32>
    %111 = vector.shape_cast %110 : vector<1x2x8xf32> to vector<2x8xf32>
    %112 = vector.shape_cast %109 : vector<2x8xf32> to vector<1x2x8xf32>
    tpu.vector_store %arg9[%c0_47, %c0_48, %c0_49], %112 {strides = array<i32>} : memref<1x2x8xf32, #tpu.memory_space<vmem>>, vector<1x2x8xf32>,
    return
  }
  func.func @transform_0(%arg0: i32) -> (i32, i32, i32) {
    %c0_i32 = arith.constant 0 : i32
    %c0_i32_0 = arith.constant 0 : i32
    %c0_i32_1 = arith.constant 0 : i32
    return %arg0, %c0_i32, %c0_i32_0 : i32, i32, i32
  }
  func.func @transform_1(%arg0: i32) -> (i32, i32, i32) {
    %c7_i32 = arith.constant 7 : i32
    %0 = arith.subi %c7_i32, %arg0 : i32
    %c0_i32 = arith.constant 0 : i32
    %c0_i32_0 = arith.constant 0 : i32
    %c0_i32_1 = arith.constant 0 : i32
    return %0, %c0_i32, %c0_i32_0 : i32, i32, i32
  }
  func.func @transform_2(%arg0: i32) -> (i32, i32, i32) {
    %c0_i32 = arith.constant 0 : i32
    %c0_i32_0 = arith.constant 0 : i32
    %c0_i32_1 = arith.constant 0 : i32
    return %arg0, %c0_i32, %c0_i32_0 : i32, i32, i32
  }
  func.func @transform_3(%arg0: i32) -> (i32, i32, i32) {
    %c7_i32 = arith.constant 7 : i32
    %0 = arith.subi %c7_i32, %arg0 : i32
    %c0_i32 = arith.constant 0 : i32
    %c0_i32_0 = arith.constant 0 : i32
    %c0_i32_1 = arith.constant 0 : i32
    return %0, %c0_i32, %c0_i32_0 : i32, i32, i32
  }
  func.func @transform_4(%arg0: i32) -> (i32, i32) {
    %c0_i32 = arith.constant 0 : i32
    %c0_i32_0 = arith.constant 0 : i32
    %c0_i32_1 = arith.constant 0 : i32
    return %c0_i32, %c0_i32_0 : i32, i32
  }
  func.func @transform_5(%arg0: i32) -> (i32, i32, i32) {
    %c0_i32 = arith.constant 0 : i32
    %c0_i32_0 = arith.constant 0 : i32
    %c0_i32_1 = arith.constant 0 : i32
    %c0_i32_2 = arith.constant 0 : i32
    return %c0_i32, %c0_i32_0, %c0_i32_1 : i32, i32, i32
  }
  func.func @transform_6(%arg0: i32) -> (i32, i32, i32) {
    %c0_i32 = arith.constant 0 : i32
    %c0_i32_0 = arith.constant 0 : i32
    %c0_i32_1 = arith.constant 0 : i32
    %c0_i32_2 = arith.constant 0 : i32
    return %c0_i32, %c0_i32_0, %c0_i32_1 : i32, i32, i32
  }
  func.func @transform_7(%arg0: i32) -> (i32, i32, i32) {
    %c0_i32 = arith.constant 0 : i32
    %c0_i32_0 = arith.constant 0 : i32
    %c0_i32_1 = arith.constant 0 : i32
    return %arg0, %c0_i32, %c0_i32_0 : i32, i32, i32
  }
  func.func @transform_8(%arg0: i32) -> (i32, i32, i32) {
    %c7_i32 = arith.constant 7 : i32
    %0 = arith.subi %c7_i32, %arg0 : i32
    %c0_i32 = arith.constant 0 : i32
    %c0_i32_0 = arith.constant 0 : i32
    %c0_i32_1 = arith.constant 0 : i32
    return %0, %c0_i32, %c0_i32_0 : i32, i32, i32
  }
}

module attributes {stable_mosaic.version = 11 : i64} {
  func.func @_attn_mean_kernel(%arg0: i32, %arg1: memref<1x8x16xf32, #tpu.memory_space<vmem>>, %arg2: memref<1x1x8xf32, #tpu.memory_space<vmem>>, %arg3: memref<1x8x1xf32, #tpu.memory_space<vmem>>, %arg4: memref<16x16xf32, #tpu.memory_space<vmem>>, %arg5: memref<1x16xf32, #tpu.memory_space<vmem>>, %arg6: memref<1x1x32xf32, #tpu.memory_space<vmem>>) attributes {dimension_semantics = [#tpu.dimension_semantics<parallel>], iteration_bounds = array<i64: 2>, scalar_prefetch = 0 : i64, scratch_operands = 0 : i64, tpu.core_type = #tpu.core_type<tc>, window_params = [{transform_indices = @transform_0, window_bounds = array<i64: 1, 8, 16>}, {transform_indices = @transform_1, window_bounds = array<i64: 1, 1, 8>}, {transform_indices = @transform_2, window_bounds = array<i64: 1, 8, 1>}, {pipeline_mode = #tpu.pipeline_mode<synchronous>, transform_indices = @transform_3, window_bounds = array<i64: 16, 16>}, {pipeline_mode = #tpu.pipeline_mode<synchronous>, transform_indices = @transform_4, window_bounds = array<i64: 1, 16>}, {transform_indices = @transform_5, window_bounds = array<i64: 1, 1, 32>}]} {
    %c0 = arith.constant 0 : index
    %c0_0 = arith.constant 0 : index
    %c0_1 = arith.constant 0 : index
    %0 = vector.load %arg1[%c0, %c0_0, %c0_1] : memref<1x8x16xf32, #tpu.memory_space<vmem>>, vector<1x8x16xf32>
    %1 = vector.shape_cast %0 : vector<1x8x16xf32> to vector<8x16xf32>
    %c0_2 = arith.constant 0 : index
    %c0_3 = arith.constant 0 : index
    %c0_4 = arith.constant 0 : index
    %2 = vector.load %arg2[%c0_2, %c0_3, %c0_4] : memref<1x1x8xf32, #tpu.memory_space<vmem>>, vector<1x1x8xf32>
    %3 = vector.shape_cast %2 : vector<1x1x8xf32> to vector<1x8xf32>
    %c0_5 = arith.constant 0 : index
    %c0_6 = arith.constant 0 : index
    %c0_7 = arith.constant 0 : index
    %4 = vector.load %arg3[%c0_5, %c0_6, %c0_7] : memref<1x8x1xf32, #tpu.memory_space<vmem>>, vector<1x8x1xf32>
    %5 = vector.shape_cast %4 : vector<1x8x1xf32> to vector<8x1xf32>
    %6 = arith.truncf %1 : vector<8x16xf32> to vector<8x16xbf16>
    %c0_8 = arith.constant 0 : index
    %c0_9 = arith.constant 0 : index
    %7 = vector.load %arg4[%c0_8, %c0_9] : memref<16x16xf32, #tpu.memory_space<vmem>>, vector<16x16xf32>
    %8 = arith.truncf %7 : vector<16x16xf32> to vector<16x16xbf16>
    %cst = arith.constant dense<0.000000e+00> : vector<8x16xf32>
    %9 = tpu.matmul %6, %8, %cst {dimension_numbers = #tpu.dot_dimension_numbers<[1], [0], [0], [1], [0, 0, 1, 1], [], []>} : vector<8x16xbf16>, vector<16x16xbf16>, vector<8x16xf32> -> vector<8x16xf32>
    %c0_10 = arith.constant 0 : index
    %c0_11 = arith.constant 0 : index
    %10 = vector.load %arg5[%c0_10, %c0_11] : memref<1x16xf32, #tpu.memory_space<vmem>>, vector<1x16xf32>
    %11 = vector.broadcast %10 : vector<1x16xf32> to vector<8x16xf32>
    %12 = arith.addf %9, %11 : vector<8x16xf32>
    %13 = arith.truncf %12 : vector<8x16xf32> to vector<8x16xbf16>
    %cst_12 = arith.constant dense<0.000000e+00> : vector<8x8xf32>
    %14 = tpu.matmul %13, %6, %cst_12 {dimension_numbers = #tpu.dot_dimension_numbers<[1], [1], [0], [0], [0, 0, 1, 0], [], []>} : vector<8x16xbf16>, vector<8x16xbf16>, vector<8x8xf32> -> vector<8x8xf32>
    %cst_13 = arith.constant 5.000000e-01 : f32
    %15 = vector.broadcast %cst_13 : f32 to vector<1x8xf32>
    %16 = arith.cmpf ogt, %3, %15 : vector<1x8xf32>
    %cst_14 = arith.constant -1.000000e+30 : f32
    %17 = vector.shape_cast %16 : vector<1x8xi1> to vector<1x8xi1>
    %18 = vector.broadcast %17 : vector<1x8xi1> to vector<8x8xi1>
    %19 = vector.broadcast %cst_14 : f32 to vector<8x8xf32>
    %20 = arith.select %18, %14, %19 : vector<8x8xi1>, vector<8x8xf32>
    %cst_15 = arith.constant dense<0xFF800000> : vector<8xf32>
    %21 = vector.multi_reduction <maximumf>, %20, %cst_15 [1] : vector<8x8xf32> to vector<8xf32>
    %22 = vector.shape_cast %21 : vector<8xf32> to vector<8x1xf32>
    %23 = vector.broadcast %22 : vector<8x1xf32> to vector<8x8xf32>
    %24 = arith.subf %20, %23 : vector<8x8xf32>
    %25 = math.exp %24 : vector<8x8xf32>
    %cst_16 = arith.constant dense<0.000000e+00> : vector<8xf32>
    %26 = vector.multi_reduction <add>, %25, %cst_16 [1] : vector<8x8xf32> to vector<8xf32>
    %27 = vector.shape_cast %26 : vector<8xf32> to vector<8x1xf32>
    %28 = tpu.reciprocal %27 {approx = true} : vector<8x1xf32> -> vector<8x1xf32>
    %29 = vector.broadcast %28 : vector<8x1xf32> to vector<8x8xf32>
    %30 = arith.mulf %25, %29 : vector<8x8xf32>
    %31 = arith.truncf %30 : vector<8x8xf32> to vector<8x8xbf16>
    %cst_17 = arith.constant dense<0.000000e+00> : vector<8x16xf32>
    %32 = tpu.matmul %31, %6, %cst_17 {dimension_numbers = #tpu.dot_dimension_numbers<[1], [0], [0], [1], [0, 0, 1, 1], [], []>} : vector<8x8xbf16>, vector<8x16xbf16>, vector<8x16xf32> -> vector<8x16xf32>
    %cst_18 = arith.constant dense<0.000000e+00> : vector<1xf32>
    %33 = vector.multi_reduction <add>, %5, %cst_18 [0] : vector<8x1xf32> to vector<1xf32>
    %34 = vector.shape_cast %33 : vector<1xf32> to vector<1x1xf32>
    %cst_19 = arith.constant 1.000000e+00 : f32
    %35 = vector.broadcast %cst_19 : f32 to vector<1x1xf32>
    %36 = arith.divf %35, %34 : vector<1x1xf32>
    %37 = vector.broadcast %5 : vector<8x1xf32> to vector<8x16xf32>
    %38 = arith.mulf %32, %37 : vector<8x16xf32>
    %cst_20 = arith.constant dense<0.000000e+00> : vector<16xf32>
    %39 = vector.multi_reduction <add>, %38, %cst_20 [0] : vector<8x16xf32> to vector<16xf32>
    %40 = vector.shape_cast %39 : vector<16xf32> to vector<1x16xf32>
    %41 = vector.broadcast %36 : vector<1x1xf32> to vector<1x16xf32>
    %42 = arith.mulf %40, %41 : vector<1x16xf32>
    %43 = vector.broadcast %5 : vector<8x1xf32> to vector<8x16xf32>
    %44 = arith.mulf %1, %43 : vector<8x16xf32>
    %cst_21 = arith.constant dense<0.000000e+00> : vector<16xf32>
    %45 = vector.multi_reduction <add>, %44, %cst_21 [0] : vector<8x16xf32> to vector<16xf32>
    %46 = vector.shape_cast %45 : vector<16xf32> to vector<1x16xf32>
    %47 = vector.broadcast %36 : vector<1x1xf32> to vector<1x16xf32>
    %48 = arith.mulf %46, %47 : vector<1x16xf32>
    %49 = tpu.concatenate %42, %48 in 1 : vector<1x16xf32>, vector<1x16xf32> -> vector<1x32xf32>
    %c0_22 = arith.constant 0 : index
    %c0_23 = arith.constant 0 : index
    %c0_24 = arith.constant 0 : index
    %50 = vector.load %arg6[%c0_22, %c0_23, %c0_24] : memref<1x1x32xf32, #tpu.memory_space<vmem>>, vector<1x1x32xf32>
    %51 = vector.shape_cast %50 : vector<1x1x32xf32> to vector<1x32xf32>
    %52 = vector.shape_cast %49 : vector<1x32xf32> to vector<1x1x32xf32>
    tpu.vector_store %arg6[%c0_22, %c0_23, %c0_24], %52 {strides = array<i32>} : memref<1x1x32xf32, #tpu.memory_space<vmem>>, vector<1x1x32xf32>,
    return
  }
  func.func @transform_0(%arg0: i32) -> (i32, i32, i32) {
    %c0_i32 = arith.constant 0 : i32
    %c0_i32_0 = arith.constant 0 : i32
    %c0_i32_1 = arith.constant 0 : i32
    return %arg0, %c0_i32, %c0_i32_0 : i32, i32, i32
  }
  func.func @transform_1(%arg0: i32) -> (i32, i32, i32) {
    %c0_i32 = arith.constant 0 : i32
    %c0_i32_0 = arith.constant 0 : i32
    %c0_i32_1 = arith.constant 0 : i32
    return %arg0, %c0_i32, %c0_i32_0 : i32, i32, i32
  }
  func.func @transform_2(%arg0: i32) -> (i32, i32, i32) {
    %c0_i32 = arith.constant 0 : i32
    %c0_i32_0 = arith.constant 0 : i32
    %c0_i32_1 = arith.constant 0 : i32
    return %arg0, %c0_i32, %c0_i32_0 : i32, i32, i32
  }
  func.func @transform_3(%arg0: i32) -> (i32, i32) {
    %c0_i32 = arith.constant 0 : i32
    %c0_i32_0 = arith.constant 0 : i32
    %c0_i32_1 = arith.constant 0 : i32
    return %c0_i32, %c0_i32_0 : i32, i32
  }
  func.func @transform_4(%arg0: i32) -> (i32, i32) {
    %c0_i32 = arith.constant 0 : i32
    %c0_i32_0 = arith.constant 0 : i32
    %c0_i32_1 = arith.constant 0 : i32
    return %c0_i32, %c0_i32_0 : i32, i32
  }
  func.func @transform_5(%arg0: i32) -> (i32, i32, i32) {
    %c0_i32 = arith.constant 0 : i32
    %c0_i32_0 = arith.constant 0 : i32
    %c0_i32_1 = arith.constant 0 : i32
    return %arg0, %c0_i32, %c0_i32_0 : i32, i32, i32
  }
}

module attributes {stable_mosaic.version = 11 : i64} {
  func.func @_head_kernel(%arg0: i32, %arg1: memref<2x32xf32, #tpu.memory_space<vmem>>, %arg2: memref<2x32xf32, #tpu.memory_space<vmem>>, %arg3: memref<64x8xf32, #tpu.memory_space<vmem>>, %arg4: memref<1x8xf32, #tpu.memory_space<vmem>>, %arg5: memref<8x3xf32, #tpu.memory_space<vmem>>, %arg6: memref<1x3xf32, #tpu.memory_space<vmem>>, %arg7: memref<2x3xf32, #tpu.memory_space<vmem>>) attributes {dimension_semantics = [#tpu.dimension_semantics<arbitrary>], iteration_bounds = array<i64: 1>, scalar_prefetch = 0 : i64, scratch_operands = 0 : i64, tpu.core_type = #tpu.core_type<tc>, window_params = [{pipeline_mode = #tpu.pipeline_mode<synchronous>, transform_indices = @transform_0, window_bounds = array<i64: 2, 32>}, {pipeline_mode = #tpu.pipeline_mode<synchronous>, transform_indices = @transform_1, window_bounds = array<i64: 2, 32>}, {pipeline_mode = #tpu.pipeline_mode<synchronous>, transform_indices = @transform_2, window_bounds = array<i64: 64, 8>}, {pipeline_mode = #tpu.pipeline_mode<synchronous>, transform_indices = @transform_3, window_bounds = array<i64: 1, 8>}, {pipeline_mode = #tpu.pipeline_mode<synchronous>, transform_indices = @transform_4, window_bounds = array<i64: 8, 3>}, {pipeline_mode = #tpu.pipeline_mode<synchronous>, transform_indices = @transform_5, window_bounds = array<i64: 1, 3>}, {pipeline_mode = #tpu.pipeline_mode<synchronous>, transform_indices = @transform_6, window_bounds = array<i64: 2, 3>}]} {
    %c0 = arith.constant 0 : index
    %c0_0 = arith.constant 0 : index
    %0 = vector.load %arg1[%c0, %c0_0] : memref<2x32xf32, #tpu.memory_space<vmem>>, vector<2x32xf32>
    %c0_1 = arith.constant 0 : index
    %c0_2 = arith.constant 0 : index
    %1 = vector.load %arg2[%c0_1, %c0_2] : memref<2x32xf32, #tpu.memory_space<vmem>>, vector<2x32xf32>
    %c0_3 = arith.constant 0 : index
    %c0_4 = arith.constant 0 : index
    %2 = vector.load %arg3[%c0_3, %c0_4] : memref<64x8xf32, #tpu.memory_space<vmem>>, vector<64x8xf32>
    %3 = arith.truncf %0 : vector<2x32xf32> to vector<2x32xbf16>
    %4 = vector.extract_strided_slice %2 {offsets = [0, 0], sizes = [32, 8], strides = [1, 1]} : vector<64x8xf32> to vector<32x8xf32>
    %5 = arith.truncf %4 : vector<32x8xf32> to vector<32x8xbf16>
    %cst = arith.constant dense<0.000000e+00> : vector<2x8xf32>
    %6 = tpu.matmul %3, %5, %cst {dimension_numbers = #tpu.dot_dimension_numbers<[1], [0], [0], [1], [0, 0, 1, 1], [], []>} : vector<2x32xbf16>, vector<32x8xbf16>, vector<2x8xf32> -> vector<2x8xf32>
    %7 = arith.truncf %1 : vector<2x32xf32> to vector<2x32xbf16>
    %8 = vector.extract_strided_slice %2 {offsets = [32, 0], sizes = [32, 8], strides = [1, 1]} : vector<64x8xf32> to vector<32x8xf32>
    %9 = arith.truncf %8 : vector<32x8xf32> to vector<32x8xbf16>
    %cst_5 = arith.constant dense<0.000000e+00> : vector<2x8xf32>
    %10 = tpu.matmul %7, %9, %cst_5 {dimension_numbers = #tpu.dot_dimension_numbers<[1], [0], [0], [1], [0, 0, 1, 1], [], []>} : vector<2x32xbf16>, vector<32x8xbf16>, vector<2x8xf32> -> vector<2x8xf32>
    %11 = arith.addf %6, %10 : vector<2x8xf32>
    %c0_6 = arith.constant 0 : index
    %c0_7 = arith.constant 0 : index
    %12 = vector.load %arg4[%c0_6, %c0_7] : memref<1x8xf32, #tpu.memory_space<vmem>>, vector<1x8xf32>
    %13 = vector.broadcast %12 : vector<1x8xf32> to vector<2x8xf32>
    %14 = arith.addf %11, %13 : vector<2x8xf32>
    %cst_8 = arith.constant 0.000000e+00 : f32
    %15 = vector.broadcast %cst_8 : f32 to vector<2x8xf32>
    %16 = arith.maximumf %14, %15 : vector<2x8xf32>
    %17 = arith.truncf %16 : vector<2x8xf32> to vector<2x8xbf16>
    %c0_9 = arith.constant 0 : index
    %c0_10 = arith.constant 0 : index
    %18 = vector.load %arg5[%c0_9, %c0_10] : memref<8x3xf32, #tpu.memory_space<vmem>>, vector<8x3xf32>
    %19 = arith.truncf %18 : vector<8x3xf32> to vector<8x3xbf16>
    %cst_11 = arith.constant dense<0.000000e+00> : vector<2x3xf32>
    %20 = tpu.matmul %17, %19, %cst_11 {dimension_numbers = #tpu.dot_dimension_numbers<[1], [0], [0], [1], [0, 0, 1, 1], [], []>} : vector<2x8xbf16>, vector<8x3xbf16>, vector<2x3xf32> -> vector<2x3xf32>
    %c0_12 = arith.constant 0 : index
    %c0_13 = arith.constant 0 : index
    %21 = vector.load %arg6[%c0_12, %c0_13] : memref<1x3xf32, #tpu.memory_space<vmem>>, vector<1x3xf32>
    %22 = vector.broadcast %21 : vector<1x3xf32> to vector<2x3xf32>
    %23 = arith.addf %20, %22 : vector<2x3xf32>
    %c0_14 = arith.constant 0 : index
    %c0_15 = arith.constant 0 : index
    %24 = vector.load %arg7[%c0_14, %c0_15] : memref<2x3xf32, #tpu.memory_space<vmem>>, vector<2x3xf32>
    tpu.vector_store %arg7[%c0_14, %c0_15], %23 {strides = array<i32>} : memref<2x3xf32, #tpu.memory_space<vmem>>, vector<2x3xf32>,
    return
  }
  func.func @transform_0(%arg0: i32) -> (i32, i32) {
    %c0_i32 = arith.constant 0 : i32
    %c0_i32_0 = arith.constant 0 : i32
    %c0_i32_1 = arith.constant 0 : i32
    return %c0_i32, %c0_i32_0 : i32, i32
  }
  func.func @transform_1(%arg0: i32) -> (i32, i32) {
    %c0_i32 = arith.constant 0 : i32
    %c0_i32_0 = arith.constant 0 : i32
    %c0_i32_1 = arith.constant 0 : i32
    return %c0_i32, %c0_i32_0 : i32, i32
  }
  func.func @transform_2(%arg0: i32) -> (i32, i32) {
    %c0_i32 = arith.constant 0 : i32
    %c0_i32_0 = arith.constant 0 : i32
    %c0_i32_1 = arith.constant 0 : i32
    return %c0_i32, %c0_i32_0 : i32, i32
  }
  func.func @transform_3(%arg0: i32) -> (i32, i32) {
    %c0_i32 = arith.constant 0 : i32
    %c0_i32_0 = arith.constant 0 : i32
    %c0_i32_1 = arith.constant 0 : i32
    return %c0_i32, %c0_i32_0 : i32, i32
  }
  func.func @transform_4(%arg0: i32) -> (i32, i32) {
    %c0_i32 = arith.constant 0 : i32
    %c0_i32_0 = arith.constant 0 : i32
    %c0_i32_1 = arith.constant 0 : i32
    return %c0_i32, %c0_i32_0 : i32, i32
  }
  func.func @transform_5(%arg0: i32) -> (i32, i32) {
    %c0_i32 = arith.constant 0 : i32
    %c0_i32_0 = arith.constant 0 : i32
    %c0_i32_1 = arith.constant 0 : i32
    return %c0_i32, %c0_i32_0 : i32, i32
  }
  func.func @transform_6(%arg0: i32) -> (i32, i32) {
    %c0_i32 = arith.constant 0 : i32
    %c0_i32_0 = arith.constant 0 : i32
    %c0_i32_1 = arith.constant 0 : i32
    return %c0_i32, %c0_i32_0 : i32, i32
  }
}

</mosaic_0001>

<bundles_post_ra>
// kernel: classification_forward.11
= control target key start
LH: loop header
LB: loop body
LE: loop exit
PB: predicated region body
PF: predicated region fallthrough
CT: control target
= control target key end

     0   :  { %v92_v0 = vmov 0.0   ;;  %vm93_vm0 = vmmov 0   ;;  %vm28_vm1 = vcmask 130048   ;;  %vm73_vm2 = vcmask 392192   ;;  %s135_s1 = inlined_call_operand.vmem [shape: f32[16,48], index: 1, kind: input, shape index: {}]   ;;  %s136_s0 = inlined_call_operand.vmem [shape: f32[16,16], index: 0, kind: input, shape index: {}]   ;;  %s137_s2 = inlined_call_operand.vmem [shape: f32[1,48], index: 2, kind: input, shape index: {}]   ;;  %s138_s3 = inlined_call_operand.vmem [shape: f32[16,48], index: 3, kind: output, shape index: {}]  }
   0x1   :  { %84 = vmatprep.subr.bf16.mxu0 %v92_v0  ;;  %v18_v1 = vld [vmem:[%s135_s1] sm:$0xff]  ;;  %v19_v2 = vld [vmem:[%s135_s1 + $0x8] sm:$0xff]  ;;  %86 = vmatprep.mubr.msk.bf16.mxu0 %vm93_vm0, %v92_v0 }
   0x2   :  { %v15_v3 = vld [vmem:[%s136_s0] sm:$0xff]  ;;  %v20_v4 = vpack.c.bf16 %v19_v2, %v18_v1  ;;  %v16_v5 = vld [vmem:[%s136_s0 + $0x8] sm:$0xff] }
   0x3   :  { %v17_v6 = vpack.c.bf16 %v16_v5, %v15_v3  ;;  %v80_v7 = vld [vmem:[%s137_s2] ss:$0 sm:$0xff] }
   0x4   :  { %85 = vmatpush3.bf16.msra.mxu0 %v20_v4 }
   0x7   :  { %87 = vmatmul.mubr.msk.bf16.vlgmr.msra.gmra.mrb[0].mxu0 %vm28_vm1, %v17_v6 }
  0xda   :  { %v66_v8 = vpop.f32.mrb[0].mxu0 }
  0xdb   :  { %v67_v9 = vadd.f32 %v80_v7, %v66_v8  ;;  %v88_v10 = vpop.f32.mrb[1].mxu0 }
  0xdc   :  { %v69_v11 = vpop.f32.mrb[2].mxu0 }
  0xdd   :  { %74 = vst.msk [vmem:[%s138_s3] sm:$0xff] %vm73_vm2, %v67_v9  ;;  %v70_v12 = vadd.f32 %v80_v7, %v69_v11  ;;  %v89_v13 = vpop.f32.mrb[3].mxu0 }
  0xdf   :  { %75 = vst.msk [vmem:[%s138_s3 + $0x8] sm:$0xff] %vm73_vm2, %v70_v12 }

// kernel: classification_forward.12
= control target key start
LH: loop header
LB: loop body
LE: loop exit
PB: predicated region body
PF: predicated region fallthrough
CT: control target
= control target key end

     0   :  { %s940_s27 = smov 0   ;;  %s1044_s0 = inlined_call_operand.vmem [shape: f32[6,2,48], index: 0, kind: input, shape index: {}, may-alias: {0,1}]   ;;  %s1045_s1 = inlined_call_operand.vmem [shape: f32[6,2,48], index: 1, kind: input, shape index: {}, may-alias: {0,1}]   ;;  %s1046_s2 = inlined_call_operand.vmem [shape: f32[6,2,1], index: 2, kind: input, shape index: {}, may-alias: {2,3}]   ;;  %s1047_s3 = inlined_call_operand.vmem [shape: f32[6,2,1], index: 3, kind: input, shape index: {}, may-alias: {2,3}]   ;;  %s1048_s4 = inlined_call_operand.vmem [shape: f32[2,48], index: 4, kind: input, shape index: {}]   ;;  %s1049_s5 = inlined_call_operand.vmem [shape: f32[2,8,24], index: 5, kind: input, shape index: {}]   ;;  %s1050_s6 = inlined_call_operand.vmem [shape: f32[2,1,24], index: 6, kind: input, shape index: {}]   ;;  %s1051_s7 = inlined_call_operand.vmem [shape: f32[6,2,8], index: 7, kind: output, shape index: {0}]   ;;  %s1052_s8 = inlined_call_operand.vmem [shape: f32[6,2,8], index: 8, kind: output, shape index: {1}]  }
   0x1 LB: > { %s807_s28 = sadd.s32 4294967295, %s882_s27   ;;  %p811_p0 = scmp.ge.s32.totalorder %s882_s27, 1  ;;  %s882_s27 = sphi %s940_s27, %s19_s27  }
   0x2   : > { %p301_p1 = scmp.lt.s32.totalorder %s882_s27, 7 }
   0x4   : > { %p302_p2 = pnand %p811_p0, %p301_p1 }
   0x5   : > { %p352_p3 = scmp.lt.s32.totalorder (!%p302_p2), %s807_s28, 5  ;;  %s356_s29 = ssub.s32 (!%p302_p2), 5, %s807_s28 }
   0x6   : > { %305 = sbr.rel (%p302_p2) target bundleno = 754 (0x2f2), region = 48  ;;  %p357_p4 = scmp.lt.s32.totalorder (!%p302_p2), %s356_s29, 5 }
   0x7   : > { %p818_p5 = scmp.ne.s32.totalorder (!%p302_p2), %s807_s28, 0 }
   0xd   : > { %s353_s30 = scalar_select %p352_p3, %s807_s28, 5 }
   0xe   : > { %s1054_s29 = smov (!%p357_p4, %s356_s29), 5  ;;  %385 = sbr.rel (%p818_p5) target bundleno = 21 (0x15), region = 52 }
   0xf   : > { %s948_s9 = sshll.u32 %s353_s30, 1  ;;  %s954_s13 = sshll.u32 %s1054_s29, 1  ;;  %vm386_vm0 = vcmask (!%p818_p5), 58368   ;;  %v884_v0 = vmov (!%p818_p5), 0.0  }
  0x10   : > { %s355_s12 = scalar_lea.vmem %s1044_s0, %s948_s9  ;;  %s360_s16 = scalar_lea.vmem %s1045_s1, %s954_s13  ;;  %387 = vst.msk [vmem:[#allocation2] sm:$0x3] (!%p818_p5), %vm386_vm0, %v884_v0  ;;  %388 = vst.msk [vmem:[#allocation3] sm:$0x3] (!%p818_p5), %vm386_vm0, %v884_v0 }
  0x11   : > { %s365_s19 = scalar_lea.vmem %s1046_s2, %s948_s9  ;;  %s370_s22 = scalar_lea.vmem %s1047_s3, %s954_s13 }
  0x12   : > { %s375_s25 = scalar_lea.vmem %s1051_s7, %s948_s9  ;;  %s380_s30 = scalar_lea.vmem %s1052_s8, %s954_s13 }
  0x15 PF: > { %v822_v1 = vld [vmem:[%s1049_s5 + $0x8] sm:$0xff]  ;;  %vm401_vm1 = vcmask 64512   ;;  %v885_v3 = vmov 0.0   ;;  %vm886_vm2 = vmmov 0   ;;  %v393_v4 = vld [vmem:[%s1049_s5] sm:$0xff]  ;;  %v887_v7 = vmov 0  }
  0x16   : > { %838 = vmatprep.subr.mxu1 %v885_v3  ;;  %840 = vmatprep.mubr.msk.f32.mxu1 %vm886_vm2, %v885_v3  ;;  %v824_v6 = vld [vmem:[%s1050_s6 + $0x1] ss:$0 sm:$0xff]  ;;  %v819_v9 = vld [vmem:[%s1050_s6] ss:$0 sm:$0xff]  ;;  %s888_s21 = smov 8   ;;  %s889_s23 = smov 24  }
  0x17   : > { %v979_v2 = vld [vmem:[#allocation3] sm:$0x3]  ;;  %839 = vmatpush3.msra.mxu1 %v822_v1  ;;  %833 = vmatprep.subr.mxu0 %v885_v3  ;;  %v984_v5 = vld [vmem:[#allocation2] sm:$0x3]  ;;  %s890_s24 = smov 112   ;;  %s891_s20 = smov 16  }
  0x18   : > { %841 = vmatmul.mubr.msk.f32.vlgmr.msra.gmra.mrb[0].mxu1 %vm401_vm1, %v979_v2  ;;  %834 = vmatpush3.msra.mxu0 %v393_v4  ;;  %v389_v15 = vld [vmem:[%s355_s12] sm:$0x3]  ;;  %vm527_vm3 = vcmask 58368  }
  0x19   : > { %835 = vmatprep.mubr.msk.f32.mxu0 %vm886_vm2, %v885_v3  ;;  %862 = vset.pattern.permute.xlu1 %v887_v7  ;;  %v390_v16 = vld [vmem:[%s1048_s4] sm:$0x3] }
  0x1a   : > { %836 = vmatmul.mubr.msk.f32.vlgmr.msra.gmra.mrb[0].mxu0 %vm401_vm1, %v984_v5  ;;  %863 = vset.pattern.permute.xlu0 %v887_v7  ;;  %v391_v17 = vadd.f32 %v390_v16, %v389_v15  ;;  %v535_v22 = vld [vmem:[%s360_s16] sm:$0x3] }
  0x1b   : > { %v536_v23 = vld [vmem:[%s1048_s4] sm:$0x3] }
  0x1c   : > { %v537_v24 = vadd.f32 %v536_v23, %v535_v22  ;;  %v504_v30 = vld [vmem:[%s365_s19] sm:$0x3]  ;;  %s892_s19 = smov 32  }
  0x1d   : > { %v511_v32 = vsub.f32 1.0, %v504_v30  ;;  %v654_v35 = vld [vmem:[%s370_s22] sm:$0x3]  ;;  %s894_s22 = smov 96  }
  0x1e   : > { %v661_v39 = vsub.f32 1.0, %v654_v35 }
  0xeb   : > { %v618_v8 = vpop.f32.mrb[0].mxu1 }
  0xec   : > { %v619_v10 = vadd.f32 %v824_v6, %v618_v8  ;;  %v842_v11 = vpop.f32.mrb[1].mxu1 }
  0xed   : > { %v471_v12 = vpop.f32.mrb[0].mxu0 }
  0xee   : > { %633 = vrot.lane.b32.xlu1 %v619_v10, %s888_s21  ;;  %623 = vrot.lane.b32.xlu0 %v619_v10, %s889_s23  ;;  %v472_v13 = vadd.f32 %v819_v9, %v471_v12  ;;  %v837_v14 = vpop.f32.mrb[1].mxu0 }
  0xf0   : > { %v475_v18 = vadd.f32 %v472_v13, %v391_v17 }
  0xf2   : > { %483 = vrot.lane.b32.xlu0 %v472_v13, %s890_s24  ;;  %v821_v19 = vmul.f32 -1.442695, %v475_v18  ;;  %s893_s24 = smov 120  }
  0xf4   : > { %864 = vpow2.f32 %v821_v19 }
  0xfe   : > { %v865_v20 = vpop.eup %864 }
  0xff   : > { %v479_v21 = vadd.f32 1.0, %v865_v20 }
 0x101   : > { %866 = vrcp.f32 %v479_v21 }
 0x10b   : > { %v867_v28 = vpop.eup %866 }
 0x10c   : > { %v493_v54 = vsub.f32 1.0, %v867_v28 }
 0x160   : > { %v624_v25 = vpop.permute.xlu0 %623  ;;  %v634_v37 = vpop.permute.xlu1 %633 }
 0x161   : > { %v626_v26 = vadd.f32 %v624_v25, %v537_v24 }
 0x163   : > { %v826_v27 = vmul.f32 -1.442695, %v626_v26 }
 0x164   : > { %v484_v29 = vpop.permute.xlu0 %483 }
 0x165   : > { %868 = vpow2.f32 %v826_v27  ;;  %v486_v31 = vmul.f32 %v867_v28, %v484_v29 }
 0x167   : > { %488 = vrot.lane.b32.xlu1 %v486_v31, %s891_s20 }
 0x16b   : > { %514 = vperm.xlu1 %862, %v511_v32  }
 0x16f   : > { %v869_v33 = vpop.eup %868  ;;  %507 = vperm.xlu1 %862, %v504_v30  }
 0x170   : > { %v630_v34 = vadd.f32 1.0, %v869_v33 }
 0x172   : > { %870 = vrcp.f32 %v630_v34 }
 0x173   : > { %657 = vperm.xlu1 %862, %v654_v35  }
 0x177   : > { %499 = vrot.lane.b32.xlu1 %v984_v5, %s888_s21 }
 0x17b   : > { %649 = vrot.lane.b32.xlu1 %v979_v2, %s892_s19 }
 0x17c   : > { %v871_v36 = vpop.eup %870 }
 0x17d   : > { %v636_v38 = vmul.f32 %v871_v36, %v634_v37  ;;  %v643_v59 = vsub.f32 1.0, %v871_v36 }
 0x17f   : > { %638 = vrot.lane.b32.xlu0 %v636_v38, %s891_s20 }
 0x183   : > { %664 = vperm.xlu0 %863, %v661_v39  }
 0x1d9   : > { %v489_v40 = vpop.permute.xlu1 %488 }
 0x1da   : > { %v491_v41 = vadd.f32 %v489_v40, %v391_v17 }
 0x1dc   : > { %872 = vtanh.f32 %v491_v41 }
 0x1e6   : > { %v873_v42 = vpop.eup %872 }
 0x1e7   : > { %495 = vrot.lane.b32.xlu0 %v873_v42, %s893_s24 }
 0x1ea   : > { %v515_v46 = vpop.permute.xlu1 %514 }
 0x1eb   : > { %v517_v47 = vmul.f32 %v515_v46, %v984_v5 }
 0x1ee   : > { %v508_v50 = vpop.permute.xlu1 %507 }
 0x1f1   : > { %v639_v43 = vpop.permute.xlu0 %638 }
 0x1f2   : > { %v641_v44 = vadd.f32 %v639_v43, %v537_v24  ;;  %v658_v51 = vpop.permute.xlu1 %657 }
 0x1f4   : > { %874 = vtanh.f32 %v641_v44 }
 0x1f6   : > { %v500_v52 = vpop.permute.xlu1 %499 }
 0x1f7   : > { %v502_v56 = vmul.f32 %v867_v28, %v500_v52 }
 0x1fa   : > { %v650_v57 = vpop.permute.xlu1 %649 }
 0x1fb   : > { %v652_v61 = vmul.f32 %v871_v36, %v650_v57 }
 0x1fe   : > { %v875_v45 = vpop.eup %874 }
 0x1ff   : > { %645 = vrot.lane.b32.xlu0 %v875_v45, %s893_s24 }
 0x202   : > { %v665_v48 = vpop.permute.xlu0 %664 }
 0x203   : > { %v667_v49 = vmul.f32 %v665_v48, %v979_v2  ;;  %519 = vrot.lane.b32.xlu0 %v517_v47, %s888_s21 }
 0x205   : > { %669 = vrot.lane.b32.xlu1 %v667_v49, %s892_s19 }
 0x259   : > { %v496_v53 = vpop.permute.xlu0 %495 }
 0x25a   : > { %v498_v55 = vmul.f32 %v496_v53, %v493_v54 }
 0x25c   : > { %v503_v58 = vadd.f32 %v502_v56, %v498_v55 }
 0x25e   : > { %v510_v0 = vmul.f32 %v508_v50, %v503_v58 }
 0x271   : > { %v646_v60 = vpop.permute.xlu0 %645 }
 0x272   : > { %v648_v62 = vmul.f32 %v646_v60, %v643_v59 }
 0x274   : > { %v653_v63 = vadd.f32 %v652_v61, %v648_v62 }
 0x275   : > { %v520_v1 = vpop.permute.xlu0 %519 }
 0x276   : > { %v522_v2 = vadd.f32 %v520_v1, %v510_v0  ;;  %v660_v3 = vmul.f32 %v658_v51, %v653_v63 }
 0x277   : > { %v670_v4 = vpop.permute.xlu1 %669 }
 0x278   : > { %v529_v5 = vmul.f32 %v522_v2, %v508_v50  ;;  %v672_v6 = vadd.f32 %v670_v4, %v660_v3  ;;  %524 = vrot.lane.b32.xlu0 %v522_v2, %s893_s24 }
 0x27a   : > { %531 = vrot.lane.b32.xlu1 %v529_v5, %s893_s24  ;;  %v678_v7 = vmul.f32 %v672_v6, %v658_v51 }
 0x27c   : > { %674 = vrot.lane.b32.xlu0 %v672_v6, %s894_s22 }
 0x27e   : > { %680 = vrot.lane.b32.xlu1 %v678_v7, %s894_s22 }
 0x2ea   : > { %v525_v8 = vpop.permute.xlu0 %524 }
 0x2eb   : > { %528 = vst.msk [vmem:[#allocation2] sm:$0x3] %vm527_vm3, %v525_v8 }
 0x2ec   : > { %v532_v9 = vpop.permute.xlu1 %531 }
 0x2ed   : > { %534 = vst.msk [vmem:[%s375_s25] sm:$0x3] %vm527_vm3, %v532_v9 }
 0x2ee   : > { %v675_v10 = vpop.permute.xlu0 %674 }
 0x2ef   : > { %677 = vst.msk [vmem:[#allocation3] sm:$0x3] %vm527_vm3, %v675_v10 }
 0x2f0   : > { %v681_v11 = vpop.permute.xlu1 %680 }
 0x2f1   : > { %683 = vst.msk [vmem:[%s380_s30] sm:$0x3] %vm527_vm3, %v681_v11 }
 0x2f2 PF: > { %s19_s27 = sadd.s32 1, %s882_s27  }
 0x2f3   : > { %p16_p6 = scmp.ge.s32.totalorder %s19_s27, 8  }
 0x2f5   :  { %18 = sbr.rel (!%p16_p6) target bundleno = 1 (0x1), region = 105 }

// kernel: classification_forward.15
= control target key start
LH: loop header
LB: loop body
LE: loop exit
PB: predicated region body
PF: predicated region fallthrough
CT: control target
= control target key end

     0   :  { %s633_s18 = smov 0   ;;  %s682_s0 = inlined_call_operand.vmem [shape: f32[2,6,16], index: 0, kind: input, shape index: {}]   ;;  %s683_s1 = inlined_call_operand.vmem [shape: f32[2,1,6], index: 1, kind: input, shape index: {}]   ;;  %s684_s2 = inlined_call_operand.vmem [shape: f32[2,6,1], index: 2, kind: input, shape index: {}]   ;;  %s685_s3 = inlined_call_operand.vmem [shape: f32[16,16], index: 3, kind: input, shape index: {}]   ;;  %s686_s4 = inlined_call_operand.vmem [shape: f32[1,16], index: 4, kind: input, shape index: {}]   ;;  %s687_s5 = inlined_call_operand.vmem [shape: f32[2,1,32], index: 5, kind: output, shape index: {}]  }
   0x1 LB: > { %s534_s19 = sadd.s32 4294967295, %s597_s18   ;;  %p538_p0 = scmp.ge.s32.totalorder %s597_s18, 1  ;;  %s597_s18 = sphi %s633_s18, %s15_s18  }
   0x2   : > { %p203_p1 = scmp.lt.s32.totalorder %s597_s18, 3 }
   0x4   : > { %p204_p2 = pnand %p538_p0, %p203_p1 }
   0x5   : > { %v254_v0 = vld [vmem:[%s685_s3] sm:$0xff] (!%p204_p2)  ;;  %v255_v1 = vld [vmem:[%s685_s3 + $0x8] sm:$0xff] (!%p204_p2)  ;;  %p235_p3 = scmp.lt.s32.totalorder (!%p204_p2), %s534_s19, 1  ;;  %v599_v2 = vmov (!%p204_p2), 0.0   ;;  %vm600_vm0 = vmmov (!%p204_p2), 0   ;;  %vm264_vm1 = vcmask (!%p204_p2), 130048   ;;  %v354_v15 = vlaneseq (!%p204_p2) }
   0x6   : > { %207 = sbr.rel (%p204_p2) target bundleno = 995 (0x3e3), region = 40  ;;  %553 = vmatprep.subr.bf16.mxu0 (!%p204_p2), %v599_v2  ;;  %v256_v3 = vpack.c.bf16 (!%p204_p2), %v255_v1, %v254_v0  ;;  %555 = vmatprep.mubr.msk.bf16.mxu0 (!%p204_p2), %vm600_vm0, %v599_v2  ;;  %v541_v7 = vld [vmem:[%s686_s4] ss:$0 sm:$0xff] (!%p204_p2)  ;;  %v601_v14 = vmov (!%p204_p2), 0   ;;  %vm360_vm4 = vcmask (!%p204_p2), 46080   ;;  %vm420_vm5 = vcmask (!%p204_p2), 5120  }
   0x7   : > { %559 = vmatprep.subr.bf16.mxu1 (!%p204_p2), %v599_v2  ;;  %561 = vmatprep.mubr.msk.bf16.mxu1 (!%p204_p2), %vm600_vm0, %v599_v2  ;;  %v355_v17 = vshrl.u32 (!%p204_p2), %v354_v15, 7  ;;  %vm377_vm6 = vcmask (!%p204_p2), 1042432   ;;  %vm436_vm7 = vcmask (!%p204_p2), 128000   ;;  %s602_s11 = smov (!%p204_p2), 16   ;;  %vm373_vm8 = vcmask (!%p204_p2), 48128  }
   0x8   : > { %554 = vmatpush3.bf16.msra.mxu0 (!%p204_p2), %v256_v3  ;;  %583 = vset.pattern.permute.xlu1 (!%p204_p2), %v601_v14  ;;  %vm464_vm9 = vcmask (!%p204_p2), 253952  }
   0x9   : > { %565 = vmatprep.subr.bf16.mxu0 (!%p204_p2), %v599_v2  ;;  %584 = vset.pattern.permute.xlu0 (!%p204_p2), %v601_v14  ;;  %v356_v18 = vsub.s32 (!%p204_p2), 0, %v355_v17 }
   0xd   : > { %s689_s19 = smov (!%p235_p3, %s534_s19), 1 }
   0xe   : > { %s539_s24 = sshll.u32 %s689_s19, 3  ;;  %s241_s7 = scalar_lea.vmem %s683_s1, %s689_s19 }
   0xf   : > { %s238_s27 = scalar_lea.vmem %s682_s0, %s539_s24  ;;  %v251_v16 = vld [vmem:[%s241_s7] sm:$0x1]  ;;  %s245_s10 = scalar_lea.vmem %s684_s2, %s539_s24 }
  0x10   : > { %v250_v4 = vld [vmem:[%s238_s27] sm:$0x3f]  ;;  %vm352_vm2 = vcmp.gt.f32.partialorder %v251_v16, 0.5  ;;  %s248_s14 = scalar_lea.vmem %s687_s5, %s689_s19 }
  0x11   : > { %v253_v5 = vpack.c.bf16 %v250_v4, %v250_v4  ;;  %v353_v19 = vsel %vm352_vm2, 1, %v601_v14  ;;  %v252_v27 = vld [vmem:[%s245_s10] sm:$0x3f] }
  0x12   : > { %v357_v20 = vrot.slane %v353_v19, %v356_v18  ;;  %432 = vperm.xlu1 %583, %v252_v27   ;;  %v421_v28 = vsel %vm420_vm5, %v252_v27, 0.0 }
  0x13   : > { %556 = vmatmul.mubr.msk.bf16.vlgmr.msra.gmra.mrb[0].mxu0 %vm264_vm1, %v253_v5  ;;  %v266_v6 = vsel %vm264_vm1, %v253_v5, 0  ;;  %v422_v29 = vrot.slane %v421_v28, 4  ;;  %v378_v41 = vsel %vm377_vm6, %v253_v5, 0 }
  0x14   : > { %560 = vmatpush3.bf16.xpose.msra.mxu1 %v266_v6  ;;  %567 = vmatprep.mubr.msk.bf16.mxu0 %vm600_vm0, %v599_v2  ;;  %vm358_vm3 = vcmp.eq.s32.totalorder %v357_v20, 1 }
  0x15   : > { %v423_v30 = vadd.f32 %v422_v29, %v421_v28  ;;  %566 = vmatpush3.bf16.msra.mxu0 %v378_v41 }
  0x17   : > { %v424_v31 = vrot.slane %v423_v30, 2 }
  0x19   : > { %v425_v32 = vadd.f32 %v424_v31, %v423_v30 }
  0x1b   : > { %v426_v33 = vrot.slane %v425_v32, 1 }
  0x1d   : > { %v427_v34 = vadd.f32 %v426_v33, %v425_v32 }
  0x1f   : > { %585 = vrcp.f32 %v427_v34 }
  0x29   : > { %v586_v35 = vpop.eup %585 }
  0x2a   : > { %446 = vperm.xlu1 %583, %v586_v35  }
  0x91   : > { %v433_v42 = vpop.permute.xlu1 %432 }
  0x92   : > { %v450_v43 = vmul.f32 %v433_v42, %v250_v4 }
  0x94   : > { %v451_v44 = vsel %vm436_vm7, %v450_v43, 0.0 }
  0x95   : > { %v452_v45 = vrot.slane %v451_v44, 4 }
  0x97   : > { %v453_v46 = vadd.f32 %v452_v45, %v451_v44 }
  0x99   : > { %v454_v47 = vrot.slane %v453_v46, 2 }
  0x9b   : > { %v455_v48 = vadd.f32 %v454_v47, %v453_v46 }
  0x9d   : > { %v456_v49 = vrot.slane %v455_v48, 1 }
  0x9f   : > { %v457_v51 = vadd.f32 %v456_v49, %v455_v48 }
  0xa9   : > { %v447_v50 = vpop.permute.xlu1 %446 }
  0xaa   : > { %v458_v52 = vmul.f32 %v457_v51, %v447_v50 }
  0xe6   : > { %v302_v8 = vpop.f32.mrb[0].mxu0 }
  0xe7   : > { %v303_v9 = vadd.f32 %v541_v7, %v302_v8  ;;  %v557_v10 = vpop.f32.mrb[1].mxu0 }
  0xe8   : > { %v305_v11 = vpop.f32.mrb[2].mxu0 }
  0xe9   : > { %v308_v12 = vpack.c.bf16 %v303_v9, %v303_v9  ;;  %v558_v13 = vpop.f32.mrb[3].mxu0 }
  0xeb   : > { %562 = vmatmul.mubr.msk.bf16.vlgmr.msra.gmra.mrb[0].mxu1 %vm264_vm1, %v308_v12 }
 0x1be   : > { %v346_v21 = vpop.f32.mrb[0].mxu1 }
 0x1bf   : > { %v359_v22 = vsel %vm358_vm3, %v346_v21, -1e+30  ;;  %v563_v23 = vpop.f32.mrb[1].mxu1 }
 0x1c0   : > { %v349_v24 = vpop.f32.mrb[2].mxu1  ;;  %v361_v25 = vsel %vm360_vm4, %v359_v22, -inf }
 0x1c1   : > { %362 = vmax.xlane.f32.xlu0 %v361_v25  ;;  %v564_v26 = vpop.f32.mrb[3].mxu1 }
 0x24e   : > { %v363_v36 = vpop.xlane.xlu0 %362 }
 0x24f   : > { %v364_v37 = vsub.f32 %v359_v22, %v363_v36 }
 0x251   : > { %v365_v38 = vmul.f32 1.442695, %v364_v37 }
 0x253   : > { %587 = vpow2.f32 %v365_v38 }
 0x25d   : > { %v588_v39 = vpop.eup %587 }
 0x25e   : > { %v367_v40 = vsel %vm360_vm4, %v588_v39, 0.0 }
 0x25f   : > { %368 = vadd.xlane.f32.xlu0 %v367_v40 }
 0x275   : > { %460 = vrot.lane.b32.xlu0 %v458_v52, %s602_s11 }
 0x2ec   : > { %v369_v53 = vpop.xlane.xlu0 %368 }
 0x2ed   : > { %589 = vrcp.f32 %v369_v53 }
 0x2f0   : > { %v461_v6 = vpop.permute.xlu0 %460 }
 0x2f7   : > { %v590_v54 = vpop.eup %589 }
 0x2f8   : > { %v371_v55 = vmul.f32 %v590_v54, %v588_v39 }
 0x2fa   : > { %v372_v56 = vpack.c.bf16 %v371_v55, %v371_v55 }
 0x2fc   : > { %568 = vmatmul.mubr.msk.bf16.vlgmr.msra.gmra.mrb[4].mxu0 %vm373_vm8, %v372_v56 }
 0x3cf   : > { %v414_v57 = vpop.f32.mrb[4].mxu0 }
 0x3d0   : > { %v435_v58 = vmul.f32 %v433_v42, %v414_v57  ;;  %v569_v59 = vpop.f32.mrb[5].mxu0 }
 0x3d1   : > { %v417_v60 = vpop.f32.mrb[6].mxu0 }
 0x3d2   : > { %v437_v61 = vsel %vm436_vm7, %v435_v58, 0.0  ;;  %v570_v62 = vpop.f32.mrb[7].mxu0 }
 0x3d3   : > { %v438_v63 = vrot.slane %v437_v61, 4 }
 0x3d5   : > { %v439_v0 = vadd.f32 %v438_v63, %v437_v61 }
 0x3d7   : > { %v440_v1 = vrot.slane %v439_v0, 2 }
 0x3d9   : > { %v441_v2 = vadd.f32 %v440_v1, %v439_v0 }
 0x3db   : > { %v442_v3 = vrot.slane %v441_v2, 1 }
 0x3dd   : > { %v443_v4 = vadd.f32 %v442_v3, %v441_v2 }
 0x3df   : > { %v449_v5 = vmul.f32 %v447_v50, %v443_v4 }
 0x3e1   : > { %v463_v7 = vsel %vm264_vm1, %v449_v5, %v461_v6 }
 0x3e2   : > { %465 = vst.msk [vmem:[%s248_s14] sm:$0x1] %vm464_vm9, %v463_v7 }
 0x3e3 PF: > { %s15_s18 = sadd.s32 1, %s597_s18  }
 0x3e4   : > { %p12_p4 = scmp.ge.s32.totalorder %s15_s18, 4  }
 0x3e6   :  { %14 = sbr.rel (!%p12_p4) target bundleno = 1 (0x1), region = 76 }

// kernel: classification_forward.17
= control target key start
LH: loop header
LB: loop body
LE: loop exit
PB: predicated region body
PF: predicated region fallthrough
CT: control target
= control target key end

     0   :  { %s940_s27 = smov 0   ;;  %s1044_s0 = inlined_call_operand.vmem [shape: f32[8,2,48], index: 0, kind: input, shape index: {}, may-alias: {0,1}]   ;;  %s1045_s1 = inlined_call_operand.vmem [shape: f32[8,2,48], index: 1, kind: input, shape index: {}, may-alias: {0,1}]   ;;  %s1046_s2 = inlined_call_operand.vmem [shape: f32[8,2,1], index: 2, kind: input, shape index: {}, may-alias: {2,3}]   ;;  %s1047_s3 = inlined_call_operand.vmem [shape: f32[8,2,1], index: 3, kind: input, shape index: {}, may-alias: {2,3}]   ;;  %s1048_s4 = inlined_call_operand.vmem [shape: f32[2,48], index: 4, kind: input, shape index: {}]   ;;  %s1049_s5 = inlined_call_operand.vmem [shape: f32[2,8,24], index: 5, kind: input, shape index: {}]   ;;  %s1050_s6 = inlined_call_operand.vmem [shape: f32[2,1,24], index: 6, kind: input, shape index: {}]   ;;  %s1051_s7 = inlined_call_operand.vmem [shape: f32[8,2,8], index: 7, kind: output, shape index: {0}]   ;;  %s1052_s8 = inlined_call_operand.vmem [shape: f32[8,2,8], index: 8, kind: output, shape index: {1}]  }
   0x1 LB: > { %s807_s28 = sadd.s32 4294967295, %s882_s27   ;;  %p811_p0 = scmp.ge.s32.totalorder %s882_s27, 1  ;;  %s882_s27 = sphi %s940_s27, %s19_s27  }
   0x2   : > { %p301_p1 = scmp.lt.s32.totalorder %s882_s27, 9 }
   0x4   : > { %p302_p2 = pnand %p811_p0, %p301_p1 }
   0x5   : > { %p352_p3 = scmp.lt.s32.totalorder (!%p302_p2), %s807_s28, 7  ;;  %s356_s29 = ssub.s32 (!%p302_p2), 7, %s807_s28 }
   0x6   : > { %305 = sbr.rel (%p302_p2) target bundleno = 754 (0x2f2), region = 48  ;;  %p357_p4 = scmp.lt.s32.totalorder (!%p302_p2), %s356_s29, 7 }
   0x7   : > { %p818_p5 = scmp.ne.s32.totalorder (!%p302_p2), %s807_s28, 0 }
   0xd   : > { %s353_s30 = scalar_select %p352_p3, %s807_s28, 7 }
   0xe   : > { %s1054_s29 = smov (!%p357_p4, %s356_s29), 7  ;;  %385 = sbr.rel (%p818_p5) target bundleno = 21 (0x15), region = 52 }
   0xf   : > { %s948_s9 = sshll.u32 %s353_s30, 1  ;;  %s954_s13 = sshll.u32 %s1054_s29, 1  ;;  %vm386_vm0 = vcmask (!%p818_p5), 58368   ;;  %v884_v0 = vmov (!%p818_p5), 0.0  }
  0x10   : > { %s355_s12 = scalar_lea.vmem %s1044_s0, %s948_s9  ;;  %s360_s16 = scalar_lea.vmem %s1045_s1, %s954_s13  ;;  %387 = vst.msk [vmem:[#allocation2] sm:$0x3] (!%p818_p5), %vm386_vm0, %v884_v0  ;;  %388 = vst.msk [vmem:[#allocation3] sm:$0x3] (!%p818_p5), %vm386_vm0, %v884_v0 }
  0x11   : > { %s365_s19 = scalar_lea.vmem %s1046_s2, %s948_s9  ;;  %s370_s22 = scalar_lea.vmem %s1047_s3, %s954_s13 }
  0x12   : > { %s375_s25 = scalar_lea.vmem %s1051_s7, %s948_s9  ;;  %s380_s30 = scalar_lea.vmem %s1052_s8, %s954_s13 }
  0x15 PF: > { %v822_v1 = vld [vmem:[%s1049_s5 + $0x8] sm:$0xff]  ;;  %vm401_vm1 = vcmask 64512   ;;  %v885_v3 = vmov 0.0   ;;  %vm886_vm2 = vmmov 0   ;;  %v393_v4 = vld [vmem:[%s1049_s5] sm:$0xff]  ;;  %v887_v7 = vmov 0  }
  0x16   : > { %838 = vmatprep.subr.mxu1 %v885_v3  ;;  %840 = vmatprep.mubr.msk.f32.mxu1 %vm886_vm2, %v885_v3  ;;  %v824_v6 = vld [vmem:[%s1050_s6 + $0x1] ss:$0 sm:$0xff]  ;;  %v819_v9 = vld [vmem:[%s1050_s6] ss:$0 sm:$0xff]  ;;  %s888_s21 = smov 8   ;;  %s889_s23 = smov 24  }
  0x17   : > { %v979_v2 = vld [vmem:[#allocation3] sm:$0x3]  ;;  %839 = vmatpush3.msra.mxu1 %v822_v1  ;;  %833 = vmatprep.subr.mxu0 %v885_v3  ;;  %v984_v5 = vld [vmem:[#allocation2] sm:$0x3]  ;;  %s890_s24 = smov 112   ;;  %s891_s20 = smov 16  }
  0x18   : > { %841 = vmatmul.mubr.msk.f32.vlgmr.msra.gmra.mrb[0].mxu1 %vm401_vm1, %v979_v2  ;;  %834 = vmatpush3.msra.mxu0 %v393_v4  ;;  %v389_v15 = vld [vmem:[%s355_s12] sm:$0x3]  ;;  %vm527_vm3 = vcmask 58368  }
  0x19   : > { %835 = vmatprep.mubr.msk.f32.mxu0 %vm886_vm2, %v885_v3  ;;  %862 = vset.pattern.permute.xlu1 %v887_v7  ;;  %v390_v16 = vld [vmem:[%s1048_s4] sm:$0x3] }
  0x1a   : > { %836 = vmatmul.mubr.msk.f32.vlgmr.msra.gmra.mrb[0].mxu0 %vm401_vm1, %v984_v5  ;;  %863 = vset.pattern.permute.xlu0 %v887_v7  ;;  %v391_v17 = vadd.f32 %v390_v16, %v389_v15  ;;  %v535_v22 = vld [vmem:[%s360_s16] sm:$0x3] }
  0x1b   : > { %v536_v23 = vld [vmem:[%s1048_s4] sm:$0x3] }
  0x1c   : > { %v537_v24 = vadd.f32 %v536_v23, %v535_v22  ;;  %v504_v30 = vld [vmem:[%s365_s19] sm:$0x3]  ;;  %s892_s19 = smov 32  }
  0x1d   : > { %v511_v32 = vsub.f32 1.0, %v504_v30  ;;  %v654_v35 = vld [vmem:[%s370_s22] sm:$0x3]  ;;  %s894_s22 = smov 96  }
  0x1e   : > { %v661_v39 = vsub.f32 1.0, %v654_v35 }
  0xeb   : > { %v618_v8 = vpop.f32.mrb[0].mxu1 }
  0xec   : > { %v619_v10 = vadd.f32 %v824_v6, %v618_v8  ;;  %v842_v11 = vpop.f32.mrb[1].mxu1 }
  0xed   : > { %v471_v12 = vpop.f32.mrb[0].mxu0 }
  0xee   : > { %633 = vrot.lane.b32.xlu1 %v619_v10, %s888_s21  ;;  %623 = vrot.lane.b32.xlu0 %v619_v10, %s889_s23  ;;  %v472_v13 = vadd.f32 %v819_v9, %v471_v12  ;;  %v837_v14 = vpop.f32.mrb[1].mxu0 }
  0xf0   : > { %v475_v18 = vadd.f32 %v472_v13, %v391_v17 }
  0xf2   : > { %483 = vrot.lane.b32.xlu0 %v472_v13, %s890_s24  ;;  %v821_v19 = vmul.f32 -1.442695, %v475_v18  ;;  %s893_s24 = smov 120  }
  0xf4   : > { %864 = vpow2.f32 %v821_v19 }
  0xfe   : > { %v865_v20 = vpop.eup %864 }
  0xff   : > { %v479_v21 = vadd.f32 1.0, %v865_v20 }
 0x101   : > { %866 = vrcp.f32 %v479_v21 }
 0x10b   : > { %v867_v28 = vpop.eup %866 }
 0x10c   : > { %v493_v54 = vsub.f32 1.0, %v867_v28 }
 0x160   : > { %v624_v25 = vpop.permute.xlu0 %623  ;;  %v634_v37 = vpop.permute.xlu1 %633 }
 0x161   : > { %v626_v26 = vadd.f32 %v624_v25, %v537_v24 }
 0x163   : > { %v826_v27 = vmul.f32 -1.442695, %v626_v26 }
 0x164   : > { %v484_v29 = vpop.permute.xlu0 %483 }
 0x165   : > { %868 = vpow2.f32 %v826_v27  ;;  %v486_v31 = vmul.f32 %v867_v28, %v484_v29 }
 0x167   : > { %488 = vrot.lane.b32.xlu1 %v486_v31, %s891_s20 }
 0x16b   : > { %514 = vperm.xlu1 %862, %v511_v32  }
 0x16f   : > { %v869_v33 = vpop.eup %868  ;;  %507 = vperm.xlu1 %862, %v504_v30  }
 0x170   : > { %v630_v34 = vadd.f32 1.0, %v869_v33 }
 0x172   : > { %870 = vrcp.f32 %v630_v34 }
 0x173   : > { %657 = vperm.xlu1 %862, %v654_v35  }
 0x177   : > { %499 = vrot.lane.b32.xlu1 %v984_v5, %s888_s21 }
 0x17b   : > { %649 = vrot.lane.b32.xlu1 %v979_v2, %s892_s19 }
 0x17c   : > { %v871_v36 = vpop.eup %870 }
 0x17d   : > { %v636_v38 = vmul.f32 %v871_v36, %v634_v37  ;;  %v643_v59 = vsub.f32 1.0, %v871_v36 }
 0x17f   : > { %638 = vrot.lane.b32.xlu0 %v636_v38, %s891_s20 }
 0x183   : > { %664 = vperm.xlu0 %863, %v661_v39  }
 0x1d9   : > { %v489_v40 = vpop.permute.xlu1 %488 }
 0x1da   : > { %v491_v41 = vadd.f32 %v489_v40, %v391_v17 }
 0x1dc   : > { %872 = vtanh.f32 %v491_v41 }
 0x1e6   : > { %v873_v42 = vpop.eup %872 }
 0x1e7   : > { %495 = vrot.lane.b32.xlu0 %v873_v42, %s893_s24 }
 0x1ea   : > { %v515_v46 = vpop.permute.xlu1 %514 }
 0x1eb   : > { %v517_v47 = vmul.f32 %v515_v46, %v984_v5 }
 0x1ee   : > { %v508_v50 = vpop.permute.xlu1 %507 }
 0x1f1   : > { %v639_v43 = vpop.permute.xlu0 %638 }
 0x1f2   : > { %v641_v44 = vadd.f32 %v639_v43, %v537_v24  ;;  %v658_v51 = vpop.permute.xlu1 %657 }
 0x1f4   : > { %874 = vtanh.f32 %v641_v44 }
 0x1f6   : > { %v500_v52 = vpop.permute.xlu1 %499 }
 0x1f7   : > { %v502_v56 = vmul.f32 %v867_v28, %v500_v52 }
 0x1fa   : > { %v650_v57 = vpop.permute.xlu1 %649 }
 0x1fb   : > { %v652_v61 = vmul.f32 %v871_v36, %v650_v57 }
 0x1fe   : > { %v875_v45 = vpop.eup %874 }
 0x1ff   : > { %645 = vrot.lane.b32.xlu0 %v875_v45, %s893_s24 }
 0x202   : > { %v665_v48 = vpop.permute.xlu0 %664 }
 0x203   : > { %v667_v49 = vmul.f32 %v665_v48, %v979_v2  ;;  %519 = vrot.lane.b32.xlu0 %v517_v47, %s888_s21 }
 0x205   : > { %669 = vrot.lane.b32.xlu1 %v667_v49, %s892_s19 }
 0x259   : > { %v496_v53 = vpop.permute.xlu0 %495 }
 0x25a   : > { %v498_v55 = vmul.f32 %v496_v53, %v493_v54 }
 0x25c   : > { %v503_v58 = vadd.f32 %v502_v56, %v498_v55 }
 0x25e   : > { %v510_v0 = vmul.f32 %v508_v50, %v503_v58 }
 0x271   : > { %v646_v60 = vpop.permute.xlu0 %645 }
 0x272   : > { %v648_v62 = vmul.f32 %v646_v60, %v643_v59 }
 0x274   : > { %v653_v63 = vadd.f32 %v652_v61, %v648_v62 }
 0x275   : > { %v520_v1 = vpop.permute.xlu0 %519 }
 0x276   : > { %v522_v2 = vadd.f32 %v520_v1, %v510_v0  ;;  %v660_v3 = vmul.f32 %v658_v51, %v653_v63 }
 0x277   : > { %v670_v4 = vpop.permute.xlu1 %669 }
 0x278   : > { %v529_v5 = vmul.f32 %v522_v2, %v508_v50  ;;  %v672_v6 = vadd.f32 %v670_v4, %v660_v3  ;;  %524 = vrot.lane.b32.xlu0 %v522_v2, %s893_s24 }
 0x27a   : > { %531 = vrot.lane.b32.xlu1 %v529_v5, %s893_s24  ;;  %v678_v7 = vmul.f32 %v672_v6, %v658_v51 }
 0x27c   : > { %674 = vrot.lane.b32.xlu0 %v672_v6, %s894_s22 }
 0x27e   : > { %680 = vrot.lane.b32.xlu1 %v678_v7, %s894_s22 }
 0x2ea   : > { %v525_v8 = vpop.permute.xlu0 %524 }
 0x2eb   : > { %528 = vst.msk [vmem:[#allocation2] sm:$0x3] %vm527_vm3, %v525_v8 }
 0x2ec   : > { %v532_v9 = vpop.permute.xlu1 %531 }
 0x2ed   : > { %534 = vst.msk [vmem:[%s375_s25] sm:$0x3] %vm527_vm3, %v532_v9 }
 0x2ee   : > { %v675_v10 = vpop.permute.xlu0 %674 }
 0x2ef   : > { %677 = vst.msk [vmem:[#allocation3] sm:$0x3] %vm527_vm3, %v675_v10 }
 0x2f0   : > { %v681_v11 = vpop.permute.xlu1 %680 }
 0x2f1   : > { %683 = vst.msk [vmem:[%s380_s30] sm:$0x3] %vm527_vm3, %v681_v11 }
 0x2f2 PF: > { %s19_s27 = sadd.s32 1, %s882_s27  }
 0x2f3   : > { %p16_p6 = scmp.ge.s32.totalorder %s19_s27, 10  }
 0x2f5   :  { %18 = sbr.rel (!%p16_p6) target bundleno = 1 (0x1), region = 105 }

// kernel: classification_forward.20
= control target key start
LH: loop header
LB: loop body
LE: loop exit
PB: predicated region body
PF: predicated region fallthrough
CT: control target
= control target key end

     0   :  { %s631_s18 = smov 0   ;;  %s681_s0 = inlined_call_operand.vmem [shape: f32[2,8,16], index: 0, kind: input, shape index: {}]   ;;  %s682_s1 = inlined_call_operand.vmem [shape: f32[2,1,8], index: 1, kind: input, shape index: {}]   ;;  %s683_s2 = inlined_call_operand.vmem [shape: f32[2,8,1], index: 2, kind: input, shape index: {}]   ;;  %s684_s3 = inlined_call_operand.vmem [shape: f32[16,16], index: 3, kind: input, shape index: {}]   ;;  %s685_s4 = inlined_call_operand.vmem [shape: f32[1,16], index: 4, kind: input, shape index: {}]   ;;  %s686_s5 = inlined_call_operand.vmem [shape: f32[2,1,32], index: 5, kind: output, shape index: {}]  }
   0x1 LB: > { %s532_s19 = sadd.s32 4294967295, %s595_s18   ;;  %p536_p0 = scmp.ge.s32.totalorder %s595_s18, 1  ;;  %s595_s18 = sphi %s631_s18, %s15_s18  }
   0x2   : > { %p203_p1 = scmp.lt.s32.totalorder %s595_s18, 3 }
   0x4   : > { %p204_p2 = pnand %p536_p0, %p203_p1 }
   0x5   : > { %v254_v0 = vld [vmem:[%s684_s3] sm:$0xff] (!%p204_p2)  ;;  %v255_v1 = vld [vmem:[%s684_s3 + $0x8] sm:$0xff] (!%p204_p2)  ;;  %p235_p3 = scmp.lt.s32.totalorder (!%p204_p2), %s532_s19, 1  ;;  %v597_v2 = vmov (!%p204_p2), 0.0   ;;  %vm598_vm0 = vmmov (!%p204_p2), 0   ;;  %vm264_vm1 = vcmask (!%p204_p2), 130048   ;;  %v354_v15 = vlaneseq (!%p204_p2) }
   0x6   : > { %207 = sbr.rel (%p204_p2) target bundleno = 995 (0x3e3), region = 40  ;;  %551 = vmatprep.subr.bf16.mxu0 (!%p204_p2), %v597_v2  ;;  %v256_v3 = vpack.c.bf16 (!%p204_p2), %v255_v1, %v254_v0  ;;  %553 = vmatprep.mubr.msk.bf16.mxu0 (!%p204_p2), %vm598_vm0, %v597_v2  ;;  %v539_v7 = vld [vmem:[%s685_s4] ss:$0 sm:$0xff] (!%p204_p2)  ;;  %v599_v14 = vmov (!%p204_p2), 0   ;;  %vm360_vm4 = vcmask (!%p204_p2), 64512   ;;  %vm419_vm5 = vcmask (!%p204_p2), 7168  }
   0x7   : > { %557 = vmatprep.subr.bf16.mxu1 (!%p204_p2), %v597_v2  ;;  %559 = vmatprep.mubr.msk.bf16.mxu1 (!%p204_p2), %vm598_vm0, %v597_v2  ;;  %v355_v17 = vshrl.u32 (!%p204_p2), %v354_v15, 7  ;;  %vm376_vm6 = vcmask (!%p204_p2), 1043456   ;;  %s600_s11 = smov (!%p204_p2), 16   ;;  %vm462_vm7 = vcmask (!%p204_p2), 253952  }
   0x8   : > { %552 = vmatpush3.bf16.msra.mxu0 (!%p204_p2), %v256_v3  ;;  %581 = vset.pattern.permute.xlu1 (!%p204_p2), %v599_v14 }
   0x9   : > { %563 = vmatprep.subr.bf16.mxu0 (!%p204_p2), %v597_v2  ;;  %582 = vset.pattern.permute.xlu0 (!%p204_p2), %v599_v14  ;;  %v356_v18 = vsub.s32 (!%p204_p2), 0, %v355_v17 }
   0xd   : > { %s688_s19 = smov (!%p235_p3, %s532_s19), 1 }
   0xe   : > { %s537_s24 = sshll.u32 %s688_s19, 3  ;;  %s241_s7 = scalar_lea.vmem %s682_s1, %s688_s19 }
   0xf   : > { %s238_s27 = scalar_lea.vmem %s681_s0, %s537_s24  ;;  %v251_v16 = vld [vmem:[%s241_s7] sm:$0x1]  ;;  %s245_s10 = scalar_lea.vmem %s683_s2, %s537_s24 }
  0x10   : > { %v250_v4 = vld [vmem:[%s238_s27] sm:$0xff]  ;;  %vm352_vm2 = vcmp.gt.f32.partialorder %v251_v16, 0.5  ;;  %s248_s14 = scalar_lea.vmem %s686_s5, %s688_s19 }
  0x11   : > { %v253_v5 = vpack.c.bf16 %v250_v4, %v250_v4  ;;  %v353_v19 = vsel %vm352_vm2, 1, %v599_v14  ;;  %v252_v27 = vld [vmem:[%s245_s10] sm:$0xff] }
  0x12   : > { %v357_v20 = vrot.slane %v353_v19, %v356_v18  ;;  %431 = vperm.xlu1 %581, %v252_v27   ;;  %v420_v28 = vsel %vm419_vm5, %v252_v27, 0.0 }
  0x13   : > { %554 = vmatmul.mubr.msk.bf16.vlgmr.msra.gmra.mrb[0].mxu0 %vm264_vm1, %v253_v5  ;;  %v266_v6 = vsel %vm264_vm1, %v253_v5, 0  ;;  %v421_v29 = vrot.slane %v420_v28, 4  ;;  %v377_v41 = vsel %vm376_vm6, %v253_v5, 0 }
  0x14   : > { %558 = vmatpush3.bf16.xpose.msra.mxu1 %v266_v6  ;;  %565 = vmatprep.mubr.msk.bf16.mxu0 %vm598_vm0, %v597_v2  ;;  %vm358_vm3 = vcmp.eq.s32.totalorder %v357_v20, 1 }
  0x15   : > { %v422_v30 = vadd.f32 %v421_v29, %v420_v28  ;;  %564 = vmatpush3.bf16.msra.mxu0 %v377_v41 }
  0x17   : > { %v423_v31 = vrot.slane %v422_v30, 2 }
  0x19   : > { %v424_v32 = vadd.f32 %v423_v31, %v422_v30 }
  0x1b   : > { %v425_v33 = vrot.slane %v424_v32, 1 }
  0x1d   : > { %v426_v34 = vadd.f32 %v425_v33, %v424_v32 }
  0x1f   : > { %583 = vrcp.f32 %v426_v34 }
  0x29   : > { %v584_v35 = vpop.eup %583 }
  0x2a   : > { %444 = vperm.xlu1 %581, %v584_v35  }
  0x91   : > { %v432_v42 = vpop.permute.xlu1 %431 }
  0x92   : > { %v448_v43 = vmul.f32 %v432_v42, %v250_v4 }
  0x94   : > { %v449_v44 = vsel %vm264_vm1, %v448_v43, 0.0 }
  0x95   : > { %v450_v45 = vrot.slane %v449_v44, 4 }
  0x97   : > { %v451_v46 = vadd.f32 %v450_v45, %v449_v44 }
  0x99   : > { %v452_v47 = vrot.slane %v451_v46, 2 }
  0x9b   : > { %v453_v48 = vadd.f32 %v452_v47, %v451_v46 }
  0x9d   : > { %v454_v49 = vrot.slane %v453_v48, 1 }
  0x9f   : > { %v455_v51 = vadd.f32 %v454_v49, %v453_v48 }
  0xa9   : > { %v445_v50 = vpop.permute.xlu1 %444 }
  0xaa   : > { %v456_v52 = vmul.f32 %v455_v51, %v445_v50 }
  0xe6   : > { %v302_v8 = vpop.f32.mrb[0].mxu0 }
  0xe7   : > { %v303_v9 = vadd.f32 %v539_v7, %v302_v8  ;;  %v555_v10 = vpop.f32.mrb[1].mxu0 }
  0xe8   : > { %v305_v11 = vpop.f32.mrb[2].mxu0 }
  0xe9   : > { %v308_v12 = vpack.c.bf16 %v303_v9, %v303_v9  ;;  %v556_v13 = vpop.f32.mrb[3].mxu0 }
  0xeb   : > { %560 = vmatmul.mubr.msk.bf16.vlgmr.msra.gmra.mrb[0].mxu1 %vm264_vm1, %v308_v12 }
 0x1be   : > { %v346_v21 = vpop.f32.mrb[0].mxu1 }
 0x1bf   : > { %v359_v22 = vsel %vm358_vm3, %v346_v21, -1e+30  ;;  %v561_v23 = vpop.f32.mrb[1].mxu1 }
 0x1c0   : > { %v349_v24 = vpop.f32.mrb[2].mxu1  ;;  %v361_v25 = vsel %vm360_vm4, %v359_v22, -inf }
 0x1c1   : > { %362 = vmax.xlane.f32.xlu0 %v361_v25  ;;  %v562_v26 = vpop.f32.mrb[3].mxu1 }
 0x24e   : > { %v363_v36 = vpop.xlane.xlu0 %362 }
 0x24f   : > { %v364_v37 = vsub.f32 %v359_v22, %v363_v36 }
 0x251   : > { %v365_v38 = vmul.f32 1.442695, %v364_v37 }
 0x253   : > { %585 = vpow2.f32 %v365_v38 }
 0x25d   : > { %v586_v39 = vpop.eup %585 }
 0x25e   : > { %v367_v40 = vsel %vm360_vm4, %v586_v39, 0.0 }
 0x25f   : > { %368 = vadd.xlane.f32.xlu0 %v367_v40 }
 0x275   : > { %458 = vrot.lane.b32.xlu0 %v456_v52, %s600_s11 }
 0x2ec   : > { %v369_v53 = vpop.xlane.xlu0 %368 }
 0x2ed   : > { %587 = vrcp.f32 %v369_v53 }
 0x2f0   : > { %v459_v6 = vpop.permute.xlu0 %458 }
 0x2f7   : > { %v588_v54 = vpop.eup %587 }
 0x2f8   : > { %v371_v55 = vmul.f32 %v588_v54, %v586_v39 }
 0x2fa   : > { %v372_v56 = vpack.c.bf16 %v371_v55, %v371_v55 }
 0x2fc   : > { %566 = vmatmul.mubr.msk.bf16.vlgmr.msra.gmra.mrb[4].mxu0 %vm360_vm4, %v372_v56 }
 0x3cf   : > { %v413_v57 = vpop.f32.mrb[4].mxu0 }
 0x3d0   : > { %v434_v58 = vmul.f32 %v432_v42, %v413_v57  ;;  %v567_v59 = vpop.f32.mrb[5].mxu0 }
 0x3d1   : > { %v416_v60 = vpop.f32.mrb[6].mxu0 }
 0x3d2   : > { %v435_v61 = vsel %vm264_vm1, %v434_v58, 0.0  ;;  %v568_v62 = vpop.f32.mrb[7].mxu0 }
 0x3d3   : > { %v436_v63 = vrot.slane %v435_v61, 4 }
 0x3d5   : > { %v437_v0 = vadd.f32 %v436_v63, %v435_v61 }
 0x3d7   : > { %v438_v1 = vrot.slane %v437_v0, 2 }
 0x3d9   : > { %v439_v2 = vadd.f32 %v438_v1, %v437_v0 }
 0x3db   : > { %v440_v3 = vrot.slane %v439_v2, 1 }
 0x3dd   : > { %v441_v4 = vadd.f32 %v440_v3, %v439_v2 }
 0x3df   : > { %v447_v5 = vmul.f32 %v445_v50, %v441_v4 }
 0x3e1   : > { %v461_v7 = vsel %vm264_vm1, %v447_v5, %v459_v6 }
 0x3e2   : > { %463 = vst.msk [vmem:[%s248_s14] sm:$0x1] %vm462_vm7, %v461_v7 }
 0x3e3 PF: > { %s15_s18 = sadd.s32 1, %s595_s18  }
 0x3e4   : > { %p12_p4 = scmp.ge.s32.totalorder %s15_s18, 4  }
 0x3e6   :  { %14 = sbr.rel (!%p12_p4) target bundleno = 1 (0x1), region = 76 }

// kernel: classification_forward.21
= control target key start
LH: loop header
LB: loop body
LE: loop exit
PB: predicated region body
PF: predicated region fallthrough
CT: control target
= control target key end

     0   :  { %v273_v3 = vmov 0.0   ;;  %vm274_vm0 = vmmov 0   ;;  %s365_s0 = inlined_call_operand.vmem [shape: f32[2,32], index: 0, kind: input, shape index: {}]   ;;  %s366_s1 = inlined_call_operand.vmem [shape: f32[2,32], index: 1, kind: input, shape index: {}]   ;;  %s367_s2 = inlined_call_operand.vmem [shape: f32[64,8], index: 2, kind: input, shape index: {}]   ;;  %s368_s3 = inlined_call_operand.vmem [shape: f32[1,8], index: 3, kind: input, shape index: {}]   ;;  %s369_s4 = inlined_call_operand.vmem [shape: f32[8,3], index: 4, kind: input, shape index: {}]   ;;  %s370_s5 = inlined_call_operand.vmem [shape: f32[1,3], index: 5, kind: input, shape index: {}]   ;;  %s371_s6 = inlined_call_operand.hbm [shape: f32[2,3], index: 6, kind: output, shape index: {}]  }
   0x1   :  { %v31_v0 = vld [vmem:[%s367_s2 + $0x20] sm:$0xff]  ;;  %v32_v1 = vld [vmem:[%s367_s2 + $0x28] sm:$0xff]  ;;  %224 = vmatprep.subr.bf16.mxu0 %v273_v3  ;;  %232 = vmatprep.subr.bf16.mxu1 %v273_v3  ;;  %v33_v6 = vld [vmem:[%s367_s2 + $0x30] sm:$0xff] }
   0x2   :  { %v27_v2 = vld [vmem:[%s367_s2] sm:$0xff]  ;;  %v39_v4 = vpack.c.bf16 %v32_v1, %v31_v0  ;;  %v28_v5 = vld [vmem:[%s367_s2 + $0x8] sm:$0xff]  ;;  %v34_v7 = vld [vmem:[%s367_s2 + $0x38] sm:$0xff]  ;;  %228 = vmatprep.mubr.msk.bf16.mxu0 %vm274_vm0, %v273_v3  ;;  %236 = vmatprep.mubr.msk.bf16.mxu1 %vm274_vm0, %v273_v3 }
   0x3   :  { %v36_v8 = vpack.c.bf16 %v28_v5, %v27_v2  ;;  %v29_v9 = vld [vmem:[%s367_s2 + $0x10] sm:$0xff]  ;;  %v30_v10 = vld [vmem:[%s367_s2 + $0x18] sm:$0xff]  ;;  %v40_v11 = vpack.c.bf16 %v34_v7, %v33_v6  ;;  %v26_v12 = vld [vmem:[%s366_s1] sm:$0x3] }
   0x4   :  { %225 = vmatpush3.bf16.msra.mxu0 %v39_v4 }
   0x5   :  { %11 = vsyncpa [#allocation3], 0  ;;  %233 = vmatpush3.bf16.msra.mxu1 %v36_v8  ;;  %226 = vmatprep.subr.bf16.mxu0 %v273_v3  ;;  %v37_v13 = vpack.c.bf16 %v30_v10, %v29_v9  ;;  %v25_v14 = vld [vmem:[%s365_s0] sm:$0x3]  ;;  %v38_v15 = vpack.c.bf16 %v26_v12, %v26_v12  ;;  %vm41_vm1 = vcmask 261120   ;;  %vm151_vm2 = vcmask 1043456  }
   0x6   :  { %234 = vmatprep.subr.bf16.mxu1 %v273_v3  ;;  %v35_v16 = vpack.c.bf16 %v25_v14, %v25_v14  ;;  %v138_v17 = vld [vmem:[%s369_s4] sm:$0xff]  ;;  %vm147_vm3 = vcmask 64512   ;;  %s275_s19 = smov [#allocation2]   ;;  %vm195_vm4 = vcmask 17408  }
   0x7   :  { %v139_v18 = vpack.c.bf16 %v138_v17, %v138_v17  ;;  %v213_v22 = vld [vmem:[%s368_s3] ss:$0 sm:$0xff]  ;;  %s203_s20 = sshll.u32 %s275_s19, 4  ;;  %s204_s20 = int_to_ptr.vmem [resolvable:$true] %s203_s20 }
   0x8   :  { %227 = vmatpush3.bf16.msra.mxu0 %v40_v11  ;;  %v214_v33 = vld [vmem:[%s370_s5] ss:$0 sm:$0xff]  ;;  %s249_s3 = scalar_lea.vmem %s204_s20, 32  ;;  %p254_p1 = scmp.lt.s32.totalorder %s204_s20, %s204_s20 }
   0x9   :  { %235 = vmatpush3.bf16.msra.mxu1 %v37_v13  ;;  %240 = vmatprep.subr.bf16.mxu0 %v273_v3  ;;  %v153_v19 = vsel %vm151_vm2, %v139_v18, 0  ;;  %p250_p0 = scmp.ne.s32.totalorder %s204_s20, %s249_s3  ;;  %p255_p2 = scmp.lt.s32.totalorder %s249_s3, %s249_s3 }
   0xb   :  { %229 = vmatmul.mubr.msk.bf16.vlgmr.msra.gmra.mrb[0].mxu0 %vm41_vm1, %v38_v15  ;;  %p256_p3 = por %p255_p2, %p254_p1 }
   0xc   :  { %237 = vmatmul.mubr.msk.bf16.vlgmr.msra.gmra.mrb[0].mxu1 %vm41_vm1, %v35_v16  ;;  %242 = vmatprep.mubr.msk.bf16.mxu0 %vm274_vm0, %v273_v3 }
   0xd   :  { %241 = vmatpush3.bf16.msra.mxu0 %v153_v19  ;;  %p257_p4 = pnand %p256_p3, %p250_p0 }
  0xde   :  { %v79_v20 = vpop.f32.mrb[0].mxu0 }
  0xdf   :  { %v122_v21 = vpop.f32.mrb[0].mxu1  ;;  %v230_v23 = vpop.f32.mrb[1].mxu0 }
  0xe0   :  { %v123_v24 = vadd.f32 %v122_v21, %v79_v20  ;;  %v238_v25 = vpop.f32.mrb[1].mxu1  ;;  %v82_v26 = vpop.f32.mrb[2].mxu0 }
  0xe1   :  { %v125_v27 = vpop.f32.mrb[2].mxu1  ;;  %v231_v28 = vpop.f32.mrb[3].mxu0 }
  0xe2   :  { %v135_v29 = vadd.f32 %v213_v22, %v123_v24  ;;  %v239_v30 = vpop.f32.mrb[3].mxu1 }
  0xe4   :  { %v136_v31 = vmax.f32 %v135_v29, 0.0 }
  0xe6   :  { %v137_v32 = vpack.c.bf16 %v136_v31, %v136_v31 }
  0xe8   :  { %243 = vmatmul.mubr.msk.bf16.vlgmr.msra.gmra.mrb[4].mxu0 %vm147_vm3, %v137_v32 }
 0x1bb   :  { %v189_v34 = vpop.f32.mrb[4].mxu0 }
 0x1bc   :  { %v190_v35 = vadd.f32 %v214_v33, %v189_v34  ;;  %v244_v36 = vpop.f32.mrb[5].mxu0 }
 0x1bd   :  { %v192_v37 = vpop.f32.mrb[6].mxu0 }
 0x1be   :  { %v245_v38 = vpop.f32.mrb[7].mxu0  ;;  %196 = vst.msk [vmem:[#allocation2] sm:$0x3] %vm195_vm4, %v190_v35 }
 0x1bf   :  { %260 = shalt.err (!%p257_p4)
}
 0x1c0   :  { %s261_s5 = scalar_lea.hbm %s371_s6, 32 }
 0x1c1   :  { %p262_p5 = scmp.ne.s32.totalorder %s371_s6, %s261_s5  ;;  %p265_p6 = scmp.lt.u32.totalorder %s261_s5, %s371_s6 }
 0x1c3   :  { %p267_p7 = pnand %p265_p6, %p262_p5 }
 0x1c5   :  { %270 = shalt.err (!%p267_p7)
}
 0x1c6   :  { %206 = dma.vmem_to_hbm [thread:$0]  %s204_s20, 32, %s371_s6, [#allocation3]  }
 0x1c7   :  { %271 = dma.done.wait [#allocation3], 32  }
 0x1c8   :  { %272 = vsyncadd [#allocation3], 4294967264 }
 0x1c9   :  { %210 = vsyncpa [#allocation3], 1 }

</bundles_post_ra>
